<compile_context>
chip_gen: v7x
topology: tpu7x:2x2x1
jax: 0.10.0
libtpu: 0.0.40
codegen_flags: <defaults>
</compile_context>

<pallas_src>
import functools
from typing import NamedTuple

import jax
import jax.numpy as jnp
from jax.experimental import pallas as pl
from jax.experimental.pallas import tpu as pltpu


_LANE = 128        # lane width  (last-dim tiling)
_SUBLANE = 8       # sublane width (second-to-last-dim tiling)


def _round_up(x, m):
    return ((x + m - 1) // m) * m


def _vmem_capacity_bytes():
    """Physical VMEM of the local chip; conservative (v7x-sized) fallback."""
    try:
        info = pltpu.get_tpu_info()
        cap = getattr(info, "vmem_capacity_bytes", None)
        if cap:
            return int(cap)
    except Exception:
        pass
    return 64 * 1024 * 1024


class DecoderDims(NamedTuple):
    E: int            # embedding dim
    He2: int          # 2 * encoder hidden
    Hd: int           # decoder hidden
    Hd_p: int         # decoder hidden padded to a lane multiple
    V: int            # vocab size
    V_p: int          # vocab padded to a multiple of TN
    TN: int           # vocab tile width (grid axis of the projection kernel)
    vmem_limit: int   # scoped VMEM limit handed to the compiler


# ------------------------------------------------------------------ kernel 1: attn+LSTM
def _attn_lstm_kernel(
    emb_ref,     # [Bp, E]        f32  embedded input tokens (dropout = eval identity)
    h_ref,       # [Bp, Hp]       f32  decoder hidden
    c_ref,       # [Bp, Hp]       f32  decoder cell
    encp_ref,    # [S, Bp, Hp]    f32  PRECOMPUTED enc @ W_attn_e (per sequence)
    enc_ref,     # [S, Bp, 2He]   bf16 encoder outputs, time-major
    mask_ref,    # [S, Bp]        f32  1.0 = valid source token
    wah_ref,     # [Hp, Hp]       bf16 attention weight (decoder-hidden rows)
    ba_ref,      # [1, Hp]        f32  attention bias
    wih_e_ref,   # [E, 4Hp]       bf16 LSTM input weights, embedding rows
    wih_w_ref,   # [2He, 4Hp]     bf16 LSTM input weights, attention-context rows
    whh_ref,     # [Hp, 4Hp]      bf16 LSTM hidden weights
    bg_ref,      # [1, 4Hp]       f32  LSTM bias (b_ih + b_hh)
    h_out_ref,   # [Bp, Hp]       f32
    c_out_ref,   # [Bp, Hp]       f32
    w_out_ref,   # [Bp, 2He]      f32  attention context (weighted encoder rep)
):
    wdt = wah_ref.dtype   # matmul-input dtype (bf16); accumulation stays f32

    emb = emb_ref[...]
    h = h_ref[...]
    c = c_ref[...]
    hp = h.shape[1]

    # ---- attention: tanh(h@Wh + enc_proj + b) -> sum over Hd -> mask -> softmax over S
    h_proj = jnp.dot(h.astype(wdt), wah_ref[...],
                     preferred_element_type=jnp.float32)                 # [Bp, Hp]
    energy = jnp.tanh(h_proj[None, :, :] + encp_ref[...] + ba_ref[...])  # [S, Bp, Hp]
    score = jnp.sum(energy, axis=2)                                      # [S, Bp]
    score = jnp.where(mask_ref[...] > 0.0, score, -1e10)
    score = score - jnp.max(score, axis=0, keepdims=True)
    p = jnp.exp(score)
    # approx reciprocal (EUP): ~1e-3-level relative error vs exact softmax; within tol.
    a = p * pl.reciprocal(jnp.sum(p, axis=0, keepdims=True), approx=True)

    # ---- attention context on VPU/XLU (keeps the MXU-push slot free)
    enc = enc_ref[...].astype(jnp.float32)
    weighted = jnp.sum(a[:, :, None] * enc, axis=0)                      # [Bp, 2He]

    # ---- single LSTM step (PyTorch gate order i, f, g, o); gate slices lane-aligned
    gates = (
        jnp.dot(emb.astype(wdt), wih_e_ref[...], preferred_element_type=jnp.float32)
        + jnp.dot(weighted.astype(wdt), wih_w_ref[...], preferred_element_type=jnp.float32)
        + jnp.dot(h.astype(wdt), whh_ref[...], preferred_element_type=jnp.float32)
        + bg_ref[...]
    )                                                                    # [Bp, 4*Hp]
    i_g = jax.nn.sigmoid(gates[:, 0 * hp:1 * hp])
    f_g = jax.nn.sigmoid(gates[:, 1 * hp:2 * hp])
    g_g = jnp.tanh(gates[:, 2 * hp:3 * hp])
    o_g = jax.nn.sigmoid(gates[:, 3 * hp:4 * hp])
    c_new = f_g * c + i_g * g_g
    h_new = o_g * jnp.tanh(c_new)

    h_out_ref[...] = h_new
    c_out_ref[...] = c_new
    w_out_ref[...] = weighted


# ----------------------------------------------------------- kernel 2: vocab projection
def _vocab_proj_kernel(
    h_ref,      # [Bp, Hp]   bf16 new hidden (cast once per step, not per tile)
    w_ref,      # [Bp, 2He]  bf16 attention context
    e_ref,      # [Bp, E]    bf16 embedded tokens
    wh_ref,     # [Hp, TN]   bf16 vocab-tile j of W_out (hidden rows)
    ww_ref,     # [2He, TN]  bf16 vocab-tile j (attention-context rows)
    we_ref,     # [E, TN]    bf16 vocab-tile j (embedding rows)
    b_ref,      # [1, TN]    f32  vocab-tile j of the output bias
    logits_ref, # [Bp, TN]   f32  vocab tile j of the logits (lane-dense store)
):
    logits_ref[...] = (
        jnp.dot(h_ref[...], wh_ref[...], preferred_element_type=jnp.float32)
        + jnp.dot(w_ref[...], ww_ref[...], preferred_element_type=jnp.float32)
        + jnp.dot(e_ref[...], we_ref[...], preferred_element_type=jnp.float32)
        + b_ref[...]
    )


# ------------------------------------------------------------------- parameter prep
def init_params(key, output_dim, emb_dim, enc_hid_dim, dec_hid_dim):
    """Deterministic synthetic parameters matching the PyTorch module's shapes (f32)."""
    ks = jax.random.split(key, 10)
    rnn_in = 2 * enc_hid_dim + emb_dim
    out_in = dec_hid_dim + 2 * enc_hid_dim + emb_dim
    s = 0.1
    return {
        "embedding": jax.random.normal(ks[0], (output_dim, emb_dim), jnp.float32) * s,
        # attention Linear(attn_in, dec_hid), split by cat order [dec_hidden; enc_out]
        "W_attn_h": jax.random.normal(ks[1], (dec_hid_dim, dec_hid_dim), jnp.float32) * s,
        "W_attn_e": jax.random.normal(ks[2], (2 * enc_hid_dim, dec_hid_dim), jnp.float32) * s,
        "b_attn": jax.random.normal(ks[3], (1, dec_hid_dim), jnp.float32) * s,
        # LSTM(rnn_in, dec_hid) -- stored transposed for x @ W
        "W_ih_T": jax.random.normal(ks[4], (rnn_in, 4 * dec_hid_dim), jnp.float32) * s,
        "W_hh_T": jax.random.normal(ks[5], (dec_hid_dim, 4 * dec_hid_dim), jnp.float32) * s,
        "b_ih": jax.random.normal(ks[6], (1, 4 * dec_hid_dim), jnp.float32) * s,
        "b_hh": jax.random.normal(ks[7], (1, 4 * dec_hid_dim), jnp.float32) * s,
        # out Linear(dec_hid + 2*enc_hid + emb, output_dim) -- stored transposed
        "W_out_T": jax.random.normal(ks[8], (out_in, output_dim), jnp.float32) * s,
        "b_out": jax.random.normal(ks[9], (1, output_dim), jnp.float32) * s,
    }


def prepare_params(params, weight_dtype=jnp.bfloat16):
    """One-time weight preparation (amortized across all decode steps):
    split the concatenated Linear/LSTM weights (static slices), zero-pad Hd to a lane
    multiple and V to a multiple of the vocab tile TN (exact-zero, semantics-preserving),
    pre-sum the LSTM biases, cast streamed matmul weights to bf16 (f32 accumulation
    in-kernel), and pick a generation-aware vocab tile / VMEM budget."""
    emb_w = params["embedding"]
    E = emb_w.shape[1]
    Hd = params["W_attn_h"].shape[0]
    He2 = params["W_attn_e"].shape[0]
    V = params["b_out"].shape[1]

    Hd_p = _round_up(Hd, _LANE)
    V_p = _round_up(V, _LANE)

    # Generation-aware vocab tile: fewer grid steps on v5e/v6e (128 MiB VMEM),
    # tighter cap on v7x (64 MiB physical / 32 MiB default scoped VMEM).
    vmem_cap = _vmem_capacity_bytes()
    if vmem_cap >= 100 * 1024 * 1024:        # v5e / v6e class
        tn_cap, vmem_limit = 2048, 80 * 1024 * 1024
    else:                                    # v7x class (64 MiB)
        tn_cap, vmem_limit = 1024, 44 * 1024 * 1024
    TN = V_p if V_p <= tn_cap else tn_cap
    rows = Hd_p + He2 + E
    # keep the double-buffered streamed bf16 weight tiles well inside the budget
    while TN > _LANE and TN % (2 * _LANE) == 0 and 4 * rows * TN * 2 > vmem_limit // 2:
        TN //= 2
    V_p = _round_up(V_p, TN)
    dH, dV = Hd_p - Hd, V_p - V

    def pad2(x, r, c):
        return jnp.pad(x, ((0, r), (0, c)))

    def pad_gate_cols(w):     # [R, 4*Hd] -> [R, 4*Hd_p]  (per-gate zero pad)
        r = w.shape[0]
        return jnp.pad(w.reshape(r, 4, Hd), ((0, 0), (0, 0), (0, dH))).reshape(r, 4 * Hd_p)

    W_ih = pad_gate_cols(params["W_ih_T"])          # rows: [emb (E) | weighted (2He)]
    W_out = params["W_out_T"]                       # rows: [h (Hd) | weighted (2He) | emb (E)]

    wd = weight_dtype
    prep = {
        "embedding": emb_w,                                            # gather stays f32
        "W_attn_h": pad2(params["W_attn_h"], dH, dH).astype(wd),
        # kept in f32: only used for the one-time per-sequence enc_proj precompute
        "W_attn_e": pad2(params["W_attn_e"], 0, dH),
        "b_attn": pad2(params["b_attn"], 0, dH),
        "W_ih_emb": W_ih[:E].astype(wd),
        "W_ih_w": W_ih[E:].astype(wd),
        "W_hh": pad2(pad_gate_cols(params["W_hh_T"]), dH, 0).astype(wd),
        "b_gates": pad_gate_cols(params["b_ih"] + params["b_hh"]),
        "W_out_h": pad2(W_out[:Hd], dH, dV).astype(wd),
        "W_out_w": pad2(W_out[Hd:Hd + He2], 0, dV).astype(wd),
        "W_out_e": pad2(W_out[Hd + He2:], 0, dV).astype(wd),
        "b_out": pad2(params["b_out"], 0, dV),
    }
    dims = DecoderDims(E=E, He2=He2, Hd=Hd, Hd_p=Hd_p, V=V, V_p=V_p, TN=TN,
                       vmem_limit=vmem_limit)
    return prep, dims


def prepare_encoder(prep, dims, encoder_outputs, mask):
    """One-time per-sequence preparation (hoisted out of the decode loop):
    pad batch to a sublane multiple, precompute the step-invariant encoder-side
    attention projection in f32, cast encoder outputs to bf16, build the [S, Bp]
    source mask.  All exact zero padding."""
    S, B, He2 = encoder_outputs.shape
    Bp = _round_up(B, _SUBLANE)
    dB = Bp - B
    enc_pad = jnp.pad(encoder_outputs, ((0, 0), (0, dB), (0, 0)))          # [S, Bp, 2He] f32
    enc_proj = jnp.einsum("sbc,cd->sbd", enc_pad, prep["W_attn_e"],
                          preferred_element_type=jnp.float32)              # [S, Bp, Hd_p] f32
    maskf = jnp.pad(jnp.transpose(mask).astype(jnp.float32), ((0, 0), (0, dB)))  # [S, Bp]
    return {"enc": enc_pad.astype(jnp.bfloat16),
            "enc_proj": enc_proj,
            "mask": maskf}


# --------------------------------------------------------------------------- wrappers
def _fused_step_padded(prep, dims, enc_prep, tok, h_pad, c_pad):
    """One decoder timestep on padded state.  tok: int32 [B];
    h_pad/c_pad: f32 [Bp, Hd_p].  Returns (logits [Bp, V_p], h_pad, c_pad)."""
    E, He2, Hd_p = dims.E, dims.He2, dims.Hd_p
    V_p, TN = dims.V_p, dims.TN
    enc = enc_prep["enc"]
    encp = enc_prep["enc_proj"]
    maskf = enc_prep["mask"]
    S, Bp = maskf.shape

    emb = prep["embedding"][tok]                       # [B, E] gather (glue)
    emb = jnp.pad(emb, ((0, Bp - emb.shape[0]), (0, 0)))

    def rep(shape):          # block == full array; constant block index
        n = len(shape)
        return pl.BlockSpec(shape, lambda j, n=n: (0,) * n)

    # ---- kernel 1: attention + LSTM (no streaming, single grid step) ----
    h_new, c_new, weighted = pl.pallas_call(
        _attn_lstm_kernel,
        grid=(1,),
        in_specs=[
            rep((Bp, E)), rep((Bp, Hd_p)), rep((Bp, Hd_p)),
            rep((S, Bp, Hd_p)), rep((S, Bp, He2)), rep((S, Bp)),
            rep((Hd_p, Hd_p)), rep((1, Hd_p)),
            rep((E, 4 * Hd_p)), rep((He2, 4 * Hd_p)), rep((Hd_p, 4 * Hd_p)),
            rep((1, 4 * Hd_p)),
        ],
        out_specs=(rep((Bp, Hd_p)), rep((Bp, Hd_p)), rep((Bp, He2))),
        out_shape=(
            jax.ShapeDtypeStruct((Bp, Hd_p), jnp.float32),
            jax.ShapeDtypeStruct((Bp, Hd_p), jnp.float32),
            jax.ShapeDtypeStruct((Bp, He2), jnp.float32),
        ),
        compiler_params=pltpu.CompilerParams(
            dimension_semantics=("arbitrary",),
            vmem_limit_bytes=dims.vmem_limit,
        ),
    )(emb, h_pad, c_pad, encp, enc, maskf,
      prep["W_attn_h"], prep["b_attn"],
      prep["W_ih_emb"], prep["W_ih_w"], prep["W_hh"], prep["b_gates"])

    # bf16 activations once per step (not once per vocab tile)
    h_bf = h_new.astype(jnp.bfloat16)
    w_bf = weighted.astype(jnp.bfloat16)
    e_bf = emb.astype(jnp.bfloat16)

    def vtile(rows):         # stream (rows, TN) vocab tiles of the output projection
        return pl.BlockSpec((rows, TN), lambda j: (0, j))

    # ---- kernel 2: vocab projection, vocab axis "parallel" (v7x: 2 TCs split W_out) ----
    logits = pl.pallas_call(
        _vocab_proj_kernel,
        grid=(V_p // TN,),
        in_specs=[
            rep((Bp, Hd_p)), rep((Bp, He2)), rep((Bp, E)),
            vtile(Hd_p), vtile(He2), vtile(E), vtile(1),
        ],
        out_specs=pl.BlockSpec((Bp, TN), lambda j: (0, j)),   # lane-dense tiles
        out_shape=jax.ShapeDtypeStruct((Bp, V_p), jnp.float32),
        compiler_params=pltpu.CompilerParams(
            dimension_semantics=("parallel",),
            vmem_limit_bytes=dims.vmem_limit,
        ),
    )(h_bf, w_bf, e_bf,
      prep["W_out_h"], prep["W_out_w"], prep["W_out_e"], prep["b_out"])

    return logits, h_new, c_new


@functools.partial(jax.jit, static_argnums=(1,))
def _decoder_step_impl(prep, dims, enc_prep, input_tokens, decoder_hidden, cell):
    Hd, Hd_p, V = dims.Hd, dims.Hd_p, dims.V
    B = input_tokens.shape[0]
    Bp = enc_prep["mask"].shape[1]
    h = jnp.pad(decoder_hidden[0], ((0, Bp - B), (0, Hd_p - Hd)))
    c = jnp.pad(cell[0], ((0, Bp - B), (0, Hd_p - Hd)))
    logits, h_new, c_new = _fused_step_padded(prep, dims, enc_prep, input_tokens, h, c)
    return (logits[:B, :V],
            h_new[:B, :Hd][None],
            c_new[:B, :Hd][None])


def decoder_step(prep, dims, enc_prep, input_tokens, decoder_hidden, cell):
    """One decoder timestep of the Seq2Seq forward loop.

    input_tokens:    int32 [B]
    decoder_hidden:  f32 [1, B, dec_hid]
    cell:            f32 [1, B, dec_hid]
    enc_prep:        per-sequence dict from prepare_encoder()
    Returns (logits [B, V], hidden [1, B, Hd], cell [1, B, Hd]).
    """
    return _decoder_step_impl(prep, dims, enc_prep, input_tokens, decoder_hidden, cell)


@functools.partial(jax.jit, static_argnums=(1,))
def decode_teacher_forced(prep, dims, enc_prep, trg, hidden, cell):
    """Fused teacher-forced decode loop (jax.lax.scan): h/c stay padded across steps,
    no per-step Python dispatch.  Mirrors Seq2SeqBaseline.forward with
    teacher_forcing_ratio=1 (the random branch / argmax feedback stays host-side).
    Returns (logits [max_len-1, B, V], final hidden, final cell)."""
    Hd, Hd_p, V = dims.Hd, dims.Hd_p, dims.V
    B = trg.shape[1]
    Bp = enc_prep["mask"].shape[1]
    h0 = jnp.pad(hidden[0], ((0, Bp - B), (0, Hd_p - Hd)))
    c0 = jnp.pad(cell[0], ((0, Bp - B), (0, Hd_p - Hd)))

    def step(carry, tok):
        h, c = carry
        logits, h, c = _fused_step_padded(prep, dims, enc_prep, tok, h, c)
        return (h, c), logits

    (hT, cT), logits = jax.lax.scan(step, (h0, c0), trg[:-1])
    return (logits[:, :B, :V],
            hT[:B, :Hd][None],
            cT[:B, :Hd][None])


# ------------------------------------------------------------------------- reference
def _reference_step(params, input_tokens, decoder_hidden, cell, encoder_outputs, mask,
                    mm_dtype=jnp.float32):
    """Pure-JAX reference mirroring the PyTorch forward (eval-mode dropout).
    mm_dtype=bfloat16 mirrors the kernel's matmul-input quantization (and bf16
    storage of encoder outputs); the enc_proj precompute stays f32 in both, matching
    prepare_encoder.  mm_dtype=float32 is the exact PyTorch math."""
    def dot(x, w):
        return jnp.dot(x.astype(mm_dtype), w.astype(mm_dtype),
                       preferred_element_type=jnp.float32)

    emb = params["embedding"][input_tokens]
    h = decoder_hidden[0]
    c = cell[0]
    enc = jnp.transpose(encoder_outputs, (1, 0, 2))          # [B, S, 2He]
    enc_q = enc.astype(mm_dtype).astype(jnp.float32)         # kernel stores enc in mm_dtype
    hd = h.shape[1]

    enc_proj = jnp.einsum("bsc,cd->bsd", enc, params["W_attn_e"],
                          preferred_element_type=jnp.float32)        # f32 precompute
    energy = jnp.tanh(dot(h, params["W_attn_h"])[:, None, :] + enc_proj + params["b_attn"])
    score = jnp.sum(energy, axis=2)
    score = jnp.where(mask.astype(jnp.float32) > 0, score, -1e10)
    a = jax.nn.softmax(score, axis=1)
    weighted = jnp.einsum("bs,bsc->bc", a, enc_q)
    rnn_in = jnp.concatenate([emb, weighted], axis=1)
    gates = (dot(rnn_in, params["W_ih_T"]) + params["b_ih"]
             + dot(h, params["W_hh_T"]) + params["b_hh"])
    i_g = jax.nn.sigmoid(gates[:, 0:hd])
    f_g = jax.nn.sigmoid(gates[:, hd:2 * hd])
    g_g = jnp.tanh(gates[:, 2 * hd:3 * hd])
    o_g = jax.nn.sigmoid(gates[:, 3 * hd:4 * hd])
    c_new = f_g * c + i_g * g_g
    h_new = o_g * jnp.tanh(c_new)
    out_in = jnp.concatenate([h_new, weighted, emb], axis=1)
    logits = dot(out_in, params["W_out_T"]) + params["b_out"]
    return logits, h_new[None], c_new[None]


def _check(name, got, want, atol, rtol):
    if not jnp.allclose(got, want, atol=atol, rtol=rtol):
        err = float(jnp.max(jnp.abs(got - want)))
        raise AssertionError(f"{name}: max |err| = {err:.3e} (atol={atol}, rtol={rtol})")


# ------------------------------------------------------------------------------ main
if __name__ == "__main__":
    # Small shapes consistent with the module.
    B, S = 2, 8
    emb_dim, enc_hid_dim, dec_hid_dim, output_dim = 32, 32, 32, 64
    max_len = 5                       # decode positions t = 1 .. max_len-1

    key = jax.random.PRNGKey(0)
    kp, k1, k2, k3, k4 = jax.random.split(key, 5)

    params = init_params(kp, output_dim, emb_dim, enc_hid_dim, dec_hid_dim)
    prep, dims = prepare_params(params)          # one-time weight prep, reused every step

    trg = jax.random.randint(k1, (max_len, B), 0, output_dim, dtype=jnp.int32)
    hidden = jax.random.normal(k2, (1, B, dec_hid_dim), jnp.float32)   # encoder-final-state stand-in
    cell = jax.random.normal(k3, (1, B, dec_hid_dim), jnp.float32)
    encoder_outputs = jax.random.normal(k4, (S, B, 2 * enc_hid_dim), jnp.float32)
    lengths = jnp.array([S, 5], dtype=jnp.int32)
    mask = (jnp.arange(S)[None, :] < lengths[:, None]).astype(jnp.int32)   # [B, S]

    # One-time per-sequence prep (hoisted padding / bf16 cast / enc @ W_attn_e precompute).
    enc_prep = prepare_encoder(prep, dims, encoder_outputs, mask)
    jax.block_until_ready(enc_prep)

    # (1) Host-loop teacher-forced decode with per-step checks against pure-JAX references
    #     (each step's references are given the kernel's previous hidden/cell, so no drift).
    step_logits = []
    h, c = hidden, cell
    inp = trg[0]
    for t in range(1, max_len):
        logits, h_new, c_new = decoder_step(prep, dims, enc_prep, inp, h, c)
        jax.block_until_ready((logits, h_new, c_new))

        ref_q = _reference_step(params, inp, h, c, encoder_outputs, mask,
                                mm_dtype=jnp.bfloat16)   # mirrors kernel quantization
        ref_f = _reference_step(params, inp, h, c, encoder_outputs, mask)
        for name, got, want in zip(("logits", "hidden", "cell"),
                                   (logits, h_new, c_new), ref_q):
            _check(f"step {t} {name} (bf16-matched ref)", got, want, atol=1e-2, rtol=1e-2)
        for name, got, want in zip(("logits", "hidden", "cell"),
                                   (logits, h_new, c_new), ref_f):
            _check(f"step {t} {name} (f32 ref)", got, want, atol=1e-1, rtol=1e-1)

        step_logits.append(logits)
        h, c = h_new, c_new
        inp = trg[t]   # teacher forcing; greedy alt: jnp.argmax(logits, axis=1).astype(jnp.int32)
    step_logits = jnp.stack(step_logits)           # [max_len-1, B, V]

    # (2) Fused lax.scan decode must reproduce the host loop.
    scan_logits, hT, cT = decode_teacher_forced(prep, dims, enc_prep, trg, hidden, cell)
    jax.block_until_ready((scan_logits, hT, cT))
    _check("scan logits vs host loop", scan_logits, step_logits, atol=1e-5, rtol=1e-5)
    _check("scan final hidden", hT, h, atol=1e-5, rtol=1e-5)
    _check("scan final cell", cT, c, atol=1e-5, rtol=1e-5)

    print("KERNEL_OK")
</pallas_src>

<mosaic_0001>
module attributes {stable_mosaic.version = 11 : i64} {
  func.func @_vocab_proj_kernel(%arg0: i32, %arg1: memref<8x128xbf16, #tpu.memory_space<vmem>>, %arg2: memref<8x64xbf16, #tpu.memory_space<vmem>>, %arg3: memref<8x32xbf16, #tpu.memory_space<vmem>>, %arg4: memref<128x128xbf16, #tpu.memory_space<vmem>>, %arg5: memref<64x128xbf16, #tpu.memory_space<vmem>>, %arg6: memref<32x128xbf16, #tpu.memory_space<vmem>>, %arg7: memref<1x128xf32, #tpu.memory_space<vmem>>, %arg8: memref<8x128xf32, #tpu.memory_space<vmem>>) attributes {dimension_semantics = [#tpu.dimension_semantics<parallel>], iteration_bounds = array<i64: 1>, scalar_prefetch = 0 : i64, scratch_operands = 0 : i64, tpu.core_type = #tpu.core_type<tc>, window_params = [{pipeline_mode = #tpu.pipeline_mode<synchronous>, transform_indices = @transform_0, window_bounds = array<i64: 8, 128>}, {pipeline_mode = #tpu.pipeline_mode<synchronous>, transform_indices = @transform_1, window_bounds = array<i64: 8, 64>}, {pipeline_mode = #tpu.pipeline_mode<synchronous>, transform_indices = @transform_2, window_bounds = array<i64: 8, 32>}, {transform_indices = @transform_3, window_bounds = array<i64: 128, 128>}, {transform_indices = @transform_4, window_bounds = array<i64: 64, 128>}, {transform_indices = @transform_5, window_bounds = array<i64: 32, 128>}, {transform_indices = @transform_6, window_bounds = array<i64: 1, 128>}, {transform_indices = @transform_7, window_bounds = array<i64: 8, 128>}]} {
    %c0 = arith.constant 0 : index
    %c0_0 = arith.constant 0 : index
    %0 = vector.load %arg1[%c0, %c0_0] : memref<8x128xbf16, #tpu.memory_space<vmem>>, vector<8x128xbf16>
    %c0_1 = arith.constant 0 : index
    %c0_2 = arith.constant 0 : index
    %1 = vector.load %arg4[%c0_1, %c0_2] : memref<128x128xbf16, #tpu.memory_space<vmem>>, vector<128x128xbf16>
    %cst = arith.constant dense<0.000000e+00> : vector<8x128xf32>
    %2 = tpu.matmul %0, %1, %cst {dimension_numbers = #tpu.dot_dimension_numbers<[1], [0], [0], [1], [0, 0, 1, 1], [], []>} : vector<8x128xbf16>, vector<128x128xbf16>, vector<8x128xf32> -> vector<8x128xf32>
    %c0_3 = arith.constant 0 : index
    %c0_4 = arith.constant 0 : index
    %3 = vector.load %arg2[%c0_3, %c0_4] : memref<8x64xbf16, #tpu.memory_space<vmem>>, vector<8x64xbf16>
    %c0_5 = arith.constant 0 : index
    %c0_6 = arith.constant 0 : index
    %4 = vector.load %arg5[%c0_5, %c0_6] : memref<64x128xbf16, #tpu.memory_space<vmem>>, vector<64x128xbf16>
    %cst_7 = arith.constant dense<0.000000e+00> : vector<8x128xf32>
    %5 = tpu.matmul %3, %4, %cst_7 {dimension_numbers = #tpu.dot_dimension_numbers<[1], [0], [0], [1], [0, 0, 1, 1], [], []>} : vector<8x64xbf16>, vector<64x128xbf16>, vector<8x128xf32> -> vector<8x128xf32>
    %6 = arith.addf %2, %5 : vector<8x128xf32>
    %c0_8 = arith.constant 0 : index
    %c0_9 = arith.constant 0 : index
    %7 = vector.load %arg3[%c0_8, %c0_9] : memref<8x32xbf16, #tpu.memory_space<vmem>>, vector<8x32xbf16>
    %c0_10 = arith.constant 0 : index
    %c0_11 = arith.constant 0 : index
    %8 = vector.load %arg6[%c0_10, %c0_11] : memref<32x128xbf16, #tpu.memory_space<vmem>>, vector<32x128xbf16>
    %cst_12 = arith.constant dense<0.000000e+00> : vector<8x128xf32>
    %9 = tpu.matmul %7, %8, %cst_12 {dimension_numbers = #tpu.dot_dimension_numbers<[1], [0], [0], [1], [0, 0, 1, 1], [], []>} : vector<8x32xbf16>, vector<32x128xbf16>, vector<8x128xf32> -> vector<8x128xf32>
    %10 = arith.addf %6, %9 : vector<8x128xf32>
    %c0_13 = arith.constant 0 : index
    %c0_14 = arith.constant 0 : index
    %11 = vector.load %arg7[%c0_13, %c0_14] : memref<1x128xf32, #tpu.memory_space<vmem>>, vector<1x128xf32>
    %12 = vector.broadcast %11 : vector<1x128xf32> to vector<8x128xf32>
    %13 = arith.addf %10, %12 : vector<8x128xf32>
    %c0_15 = arith.constant 0 : index
    %c0_16 = arith.constant 0 : index
    %14 = vector.load %arg8[%c0_15, %c0_16] : memref<8x128xf32, #tpu.memory_space<vmem>>, vector<8x128xf32>
    tpu.vector_store %arg8[%c0_15, %c0_16], %13 {strides = array<i32>} : memref<8x128xf32, #tpu.memory_space<vmem>>, vector<8x128xf32>,
    return
  }
  func.func @transform_0(%arg0: i32) -> (i32, i32) {
    %c0_i32 = arith.constant 0 : i32
    %c0_i32_0 = arith.constant 0 : i32
    %c0_i32_1 = arith.constant 0 : i32
    return %c0_i32, %c0_i32_0 : i32, i32
  }
  func.func @transform_1(%arg0: i32) -> (i32, i32) {
    %c0_i32 = arith.constant 0 : i32
    %c0_i32_0 = arith.constant 0 : i32
    %c0_i32_1 = arith.constant 0 : i32
    return %c0_i32, %c0_i32_0 : i32, i32
  }
  func.func @transform_2(%arg0: i32) -> (i32, i32) {
    %c0_i32 = arith.constant 0 : i32
    %c0_i32_0 = arith.constant 0 : i32
    %c0_i32_1 = arith.constant 0 : i32
    return %c0_i32, %c0_i32_0 : i32, i32
  }
  func.func @transform_3(%arg0: i32) -> (i32, i32) {
    %c0_i32 = arith.constant 0 : i32
    %c0_i32_0 = arith.constant 0 : i32
    return %c0_i32, %arg0 : i32, i32
  }
  func.func @transform_4(%arg0: i32) -> (i32, i32) {
    %c0_i32 = arith.constant 0 : i32
    %c0_i32_0 = arith.constant 0 : i32
    return %c0_i32, %arg0 : i32, i32
  }
  func.func @transform_5(%arg0: i32) -> (i32, i32) {
    %c0_i32 = arith.constant 0 : i32
    %c0_i32_0 = arith.constant 0 : i32
    return %c0_i32, %arg0 : i32, i32
  }
  func.func @transform_6(%arg0: i32) -> (i32, i32) {
    %c0_i32 = arith.constant 0 : i32
    %c0_i32_0 = arith.constant 0 : i32
    return %c0_i32, %arg0 : i32, i32
  }
  func.func @transform_7(%arg0: i32) -> (i32, i32) {
    %c0_i32 = arith.constant 0 : i32
    %c0_i32_0 = arith.constant 0 : i32
    return %c0_i32, %arg0 : i32, i32
  }
}

module attributes {stable_mosaic.version = 11 : i64} {
  func.func @_attn_lstm_kernel(%arg0: i32, %arg1: memref<8x32xf32, #tpu.memory_space<vmem>>, %arg2: memref<8x128xf32, #tpu.memory_space<vmem>>, %arg3: memref<8x128xf32, #tpu.memory_space<vmem>>, %arg4: memref<8x8x128xf32, #tpu.memory_space<vmem>>, %arg5: memref<8x8x64xbf16, #tpu.memory_space<vmem>>, %arg6: memref<8x8xf32, #tpu.memory_space<vmem>>, %arg7: memref<128x128xbf16, #tpu.memory_space<vmem>>, %arg8: memref<1x128xf32, #tpu.memory_space<vmem>>, %arg9: memref<32x512xbf16, #tpu.memory_space<vmem>>, %arg10: memref<64x512xbf16, #tpu.memory_space<vmem>>, %arg11: memref<128x512xbf16, #tpu.memory_space<vmem>>, %arg12: memref<1x512xf32, #tpu.memory_space<vmem>>, %arg13: memref<8x128xf32, #tpu.memory_space<vmem>>, %arg14: memref<8x128xf32, #tpu.memory_space<vmem>>, %arg15: memref<8x64xf32, #tpu.memory_space<vmem>>) attributes {dimension_semantics = [#tpu.dimension_semantics<arbitrary>], iteration_bounds = array<i64: 1>, scalar_prefetch = 0 : i64, scratch_operands = 0 : i64, tpu.core_type = #tpu.core_type<tc>, window_params = [{pipeline_mode = #tpu.pipeline_mode<synchronous>, transform_indices = @transform_0, window_bounds = array<i64: 8, 32>}, {pipeline_mode = #tpu.pipeline_mode<synchronous>, transform_indices = @transform_1, window_bounds = array<i64: 8, 128>}, {pipeline_mode = #tpu.pipeline_mode<synchronous>, transform_indices = @transform_2, window_bounds = array<i64: 8, 128>}, {pipeline_mode = #tpu.pipeline_mode<synchronous>, transform_indices = @transform_3, window_bounds = array<i64: 8, 8, 128>}, {pipeline_mode = #tpu.pipeline_mode<synchronous>, transform_indices = @transform_4, window_bounds = array<i64: 8, 8, 64>}, {pipeline_mode = #tpu.pipeline_mode<synchronous>, transform_indices = @transform_5, window_bounds = array<i64: 8, 8>}, {pipeline_mode = #tpu.pipeline_mode<synchronous>, transform_indices = @transform_6, window_bounds = array<i64: 128, 128>}, {pipeline_mode = #tpu.pipeline_mode<synchronous>, transform_indices = @transform_7, window_bounds = array<i64: 1, 128>}, {pipeline_mode = #tpu.pipeline_mode<synchronous>, transform_indices = @transform_8, window_bounds = array<i64: 32, 512>}, {pipeline_mode = #tpu.pipeline_mode<synchronous>, transform_indices = @transform_9, window_bounds = array<i64: 64, 512>}, {pipeline_mode = #tpu.pipeline_mode<synchronous>, transform_indices = @transform_10, window_bounds = array<i64: 128, 512>}, {pipeline_mode = #tpu.pipeline_mode<synchronous>, transform_indices = @transform_11, window_bounds = array<i64: 1, 512>}, {pipeline_mode = #tpu.pipeline_mode<synchronous>, transform_indices = @transform_12, window_bounds = array<i64: 8, 128>}, {pipeline_mode = #tpu.pipeline_mode<synchronous>, transform_indices = @transform_13, window_bounds = array<i64: 8, 128>}, {pipeline_mode = #tpu.pipeline_mode<synchronous>, transform_indices = @transform_14, window_bounds = array<i64: 8, 64>}]} {
    %c0 = arith.constant 0 : index
    %c0_0 = arith.constant 0 : index
    %0 = vector.load %arg1[%c0, %c0_0] : memref<8x32xf32, #tpu.memory_space<vmem>>, vector<8x32xf32>
    %c0_1 = arith.constant 0 : index
    %c0_2 = arith.constant 0 : index
    %1 = vector.load %arg2[%c0_1, %c0_2] : memref<8x128xf32, #tpu.memory_space<vmem>>, vector<8x128xf32>
    %c0_3 = arith.constant 0 : index
    %c0_4 = arith.constant 0 : index
    %2 = vector.load %arg3[%c0_3, %c0_4] : memref<8x128xf32, #tpu.memory_space<vmem>>, vector<8x128xf32>
    %3 = arith.truncf %1 : vector<8x128xf32> to vector<8x128xbf16>
    %c0_5 = arith.constant 0 : index
    %c0_6 = arith.constant 0 : index
    %4 = vector.load %arg7[%c0_5, %c0_6] : memref<128x128xbf16, #tpu.memory_space<vmem>>, vector<128x128xbf16>
    %cst = arith.constant dense<0.000000e+00> : vector<8x128xf32>
    %5 = tpu.matmul %3, %4, %cst {dimension_numbers = #tpu.dot_dimension_numbers<[1], [0], [0], [1], [0, 0, 1, 1], [], []>} : vector<8x128xbf16>, vector<128x128xbf16>, vector<8x128xf32> -> vector<8x128xf32>
    %6 = vector.shape_cast %5 : vector<8x128xf32> to vector<1x8x128xf32>
    %c0_7 = arith.constant 0 : index
    %c0_8 = arith.constant 0 : index
    %c0_9 = arith.constant 0 : index
    %7 = vector.load %arg4[%c0_7, %c0_8, %c0_9] : memref<8x8x128xf32, #tpu.memory_space<vmem>>, vector<8x8x128xf32>
    %8 = vector.broadcast %6 : vector<1x8x128xf32> to vector<8x8x128xf32>
    %9 = arith.addf %8, %7 : vector<8x8x128xf32>
    %c0_10 = arith.constant 0 : index
    %c0_11 = arith.constant 0 : index
    %10 = vector.load %arg8[%c0_10, %c0_11] : memref<1x128xf32, #tpu.memory_space<vmem>>, vector<1x128xf32>
    %11 = vector.shape_cast %10 : vector<1x128xf32> to vector<1x1x128xf32>
    %12 = vector.broadcast %11 : vector<1x1x128xf32> to vector<8x8x128xf32>
    %13 = arith.addf %9, %12 : vector<8x8x128xf32>
    %14 = math.tanh %13 : vector<8x8x128xf32>
    %cst_12 = arith.constant dense<0.000000e+00> : vector<8x8xf32>
    %15 = vector.multi_reduction <add>, %14, %cst_12 [2] : vector<8x8x128xf32> to vector<8x8xf32>
    %c0_13 = arith.constant 0 : index
    %c0_14 = arith.constant 0 : index
    %16 = vector.load %arg6[%c0_13, %c0_14] : memref<8x8xf32, #tpu.memory_space<vmem>>, vector<8x8xf32>
    %cst_15 = arith.constant 0.000000e+00 : f32
    %17 = vector.broadcast %cst_15 : f32 to vector<8x8xf32>
    %18 = arith.cmpf ogt, %16, %17 : vector<8x8xf32>
    %cst_16 = arith.constant -1.000000e+10 : f32
    %19 = vector.broadcast %cst_16 : f32 to vector<8x8xf32>
    %20 = arith.select %18, %15, %19 : vector<8x8xi1>, vector<8x8xf32>
    %cst_17 = arith.constant dense<0xFF800000> : vector<8xf32>
    %21 = vector.multi_reduction <maximumf>, %20, %cst_17 [0] : vector<8x8xf32> to vector<8xf32>
    %22 = vector.shape_cast %21 : vector<8xf32> to vector<1x8xf32>
    %23 = vector.broadcast %22 : vector<1x8xf32> to vector<8x8xf32>
    %24 = arith.subf %20, %23 : vector<8x8xf32>
    %25 = math.exp %24 : vector<8x8xf32>
    %cst_18 = arith.constant dense<0.000000e+00> : vector<8xf32>
    %26 = vector.multi_reduction <add>, %25, %cst_18 [0] : vector<8x8xf32> to vector<8xf32>
    %27 = vector.shape_cast %26 : vector<8xf32> to vector<1x8xf32>
    %28 = tpu.reciprocal %27 {approx = true} : vector<1x8xf32> -> vector<1x8xf32>
    %29 = vector.broadcast %28 : vector<1x8xf32> to vector<8x8xf32>
    %30 = arith.mulf %25, %29 : vector<8x8xf32>
    %c0_19 = arith.constant 0 : index
    %c0_20 = arith.constant 0 : index
    %c0_21 = arith.constant 0 : index
    %31 = vector.load %arg5[%c0_19, %c0_20, %c0_21] : memref<8x8x64xbf16, #tpu.memory_space<vmem>>, vector<8x8x64xbf16>
    %32 = arith.extf %31 : vector<8x8x64xbf16> to vector<8x8x64xf32>
    %33 = vector.shape_cast %30 : vector<8x8xf32> to vector<8x8x1xf32>
    %34 = vector.broadcast %33 : vector<8x8x1xf32> to vector<8x8x64xf32>
    %35 = arith.mulf %34, %32 : vector<8x8x64xf32>
    %cst_22 = arith.constant dense<0.000000e+00> : vector<8x64xf32>
    %36 = vector.multi_reduction <add>, %35, %cst_22 [0] : vector<8x8x64xf32> to vector<8x64xf32>
    %37 = arith.truncf %0 : vector<8x32xf32> to vector<8x32xbf16>
    %c0_23 = arith.constant 0 : index
    %c0_24 = arith.constant 0 : index
    %38 = vector.load %arg9[%c0_23, %c0_24] : memref<32x512xbf16, #tpu.memory_space<vmem>>, vector<32x512xbf16>
    %cst_25 = arith.constant dense<0.000000e+00> : vector<8x512xf32>
    %39 = tpu.matmul %37, %38, %cst_25 {dimension_numbers = #tpu.dot_dimension_numbers<[1], [0], [0], [1], [0, 0, 1, 1], [], []>} : vector<8x32xbf16>, vector<32x512xbf16>, vector<8x512xf32> -> vector<8x512xf32>
    %40 = arith.truncf %36 : vector<8x64xf32> to vector<8x64xbf16>
    %c0_26 = arith.constant 0 : index
    %c0_27 = arith.constant 0 : index
    %41 = vector.load %arg10[%c0_26, %c0_27] : memref<64x512xbf16, #tpu.memory_space<vmem>>, vector<64x512xbf16>
    %cst_28 = arith.constant dense<0.000000e+00> : vector<8x512xf32>
    %42 = tpu.matmul %40, %41, %cst_28 {dimension_numbers = #tpu.dot_dimension_numbers<[1], [0], [0], [1], [0, 0, 1, 1], [], []>} : vector<8x64xbf16>, vector<64x512xbf16>, vector<8x512xf32> -> vector<8x512xf32>
    %43 = arith.addf %39, %42 : vector<8x512xf32>
    %44 = arith.truncf %1 : vector<8x128xf32> to vector<8x128xbf16>
    %c0_29 = arith.constant 0 : index
    %c0_30 = arith.constant 0 : index
    %45 = vector.load %arg11[%c0_29, %c0_30] : memref<128x512xbf16, #tpu.memory_space<vmem>>, vector<128x512xbf16>
    %cst_31 = arith.constant dense<0.000000e+00> : vector<8x512xf32>
    %46 = tpu.matmul %44, %45, %cst_31 {dimension_numbers = #tpu.dot_dimension_numbers<[1], [0], [0], [1], [0, 0, 1, 1], [], []>} : vector<8x128xbf16>, vector<128x512xbf16>, vector<8x512xf32> -> vector<8x512xf32>
    %47 = arith.addf %43, %46 : vector<8x512xf32>
    %c0_32 = arith.constant 0 : index
    %c0_33 = arith.constant 0 : index
    %48 = vector.load %arg12[%c0_32, %c0_33] : memref<1x512xf32, #tpu.memory_space<vmem>>, vector<1x512xf32>
    %49 = vector.broadcast %48 : vector<1x512xf32> to vector<8x512xf32>
    %50 = arith.addf %47, %49 : vector<8x512xf32>
    %51 = vector.extract_strided_slice %50 {offsets = [0, 0], sizes = [8, 128], strides = [1, 1]} : vector<8x512xf32> to vector<8x128xf32>
    %52 = arith.negf %51 : vector<8x128xf32>
    %53 = math.exp %52 : vector<8x128xf32>
    %cst_34 = arith.constant 1.000000e+00 : f32
    %54 = vector.broadcast %cst_34 : f32 to vector<8x128xf32>
    %55 = arith.addf %54, %53 : vector<8x128xf32>
    %56 = arith.divf %54, %55 : vector<8x128xf32>
    %57 = vector.extract_strided_slice %50 {offsets = [0, 128], sizes = [8, 128], strides = [1, 1]} : vector<8x512xf32> to vector<8x128xf32>
    %58 = arith.negf %57 : vector<8x128xf32>
    %59 = math.exp %58 : vector<8x128xf32>
    %cst_35 = arith.constant 1.000000e+00 : f32
    %60 = vector.broadcast %cst_35 : f32 to vector<8x128xf32>
    %61 = arith.addf %60, %59 : vector<8x128xf32>
    %62 = arith.divf %60, %61 : vector<8x128xf32>
    %63 = vector.extract_strided_slice %50 {offsets = [0, 256], sizes = [8, 128], strides = [1, 1]} : vector<8x512xf32> to vector<8x128xf32>
    %64 = math.tanh %63 : vector<8x128xf32>
    %65 = vector.extract_strided_slice %50 {offsets = [0, 384], sizes = [8, 128], strides = [1, 1]} : vector<8x512xf32> to vector<8x128xf32>
    %66 = arith.negf %65 : vector<8x128xf32>
    %67 = math.exp %66 : vector<8x128xf32>
    %cst_36 = arith.constant 1.000000e+00 : f32
    %68 = vector.broadcast %cst_36 : f32 to vector<8x128xf32>
    %69 = arith.addf %68, %67 : vector<8x128xf32>
    %70 = arith.divf %68, %69 : vector<8x128xf32>
    %71 = arith.mulf %62, %2 : vector<8x128xf32>
    %72 = arith.mulf %56, %64 : vector<8x128xf32>
    %73 = arith.addf %71, %72 : vector<8x128xf32>
    %74 = math.tanh %73 : vector<8x128xf32>
    %75 = arith.mulf %70, %74 : vector<8x128xf32>
    %c0_37 = arith.constant 0 : index
    %c0_38 = arith.constant 0 : index
    %76 = vector.load %arg13[%c0_37, %c0_38] : memref<8x128xf32, #tpu.memory_space<vmem>>, vector<8x128xf32>
    tpu.vector_store %arg13[%c0_37, %c0_38], %75 {strides = array<i32>} : memref<8x128xf32, #tpu.memory_space<vmem>>, vector<8x128xf32>,
    %c0_39 = arith.constant 0 : index
    %c0_40 = arith.constant 0 : index
    %77 = vector.load %arg14[%c0_39, %c0_40] : memref<8x128xf32, #tpu.memory_space<vmem>>, vector<8x128xf32>
    tpu.vector_store %arg14[%c0_39, %c0_40], %73 {strides = array<i32>} : memref<8x128xf32, #tpu.memory_space<vmem>>, vector<8x128xf32>,
    %c0_41 = arith.constant 0 : index
    %c0_42 = arith.constant 0 : index
    %78 = vector.load %arg15[%c0_41, %c0_42] : memref<8x64xf32, #tpu.memory_space<vmem>>, vector<8x64xf32>
    tpu.vector_store %arg15[%c0_41, %c0_42], %36 {strides = array<i32>} : memref<8x64xf32, #tpu.memory_space<vmem>>, vector<8x64xf32>,
    return
  }
  func.func @transform_0(%arg0: i32) -> (i32, i32) {
    %c0_i32 = arith.constant 0 : i32
    %c0_i32_0 = arith.constant 0 : i32
    %c0_i32_1 = arith.constant 0 : i32
    return %c0_i32, %c0_i32_0 : i32, i32
  }
  func.func @transform_1(%arg0: i32) -> (i32, i32) {
    %c0_i32 = arith.constant 0 : i32
    %c0_i32_0 = arith.constant 0 : i32
    %c0_i32_1 = arith.constant 0 : i32
    return %c0_i32, %c0_i32_0 : i32, i32
  }
  func.func @transform_2(%arg0: i32) -> (i32, i32) {
    %c0_i32 = arith.constant 0 : i32
    %c0_i32_0 = arith.constant 0 : i32
    %c0_i32_1 = arith.constant 0 : i32
    return %c0_i32, %c0_i32_0 : i32, i32
  }
  func.func @transform_3(%arg0: i32) -> (i32, i32, i32) {
    %c0_i32 = arith.constant 0 : i32
    %c0_i32_0 = arith.constant 0 : i32
    %c0_i32_1 = arith.constant 0 : i32
    %c0_i32_2 = arith.constant 0 : i32
    return %c0_i32, %c0_i32_0, %c0_i32_1 : i32, i32, i32
  }
  func.func @transform_4(%arg0: i32) -> (i32, i32, i32) {
    %c0_i32 = arith.constant 0 : i32
    %c0_i32_0 = arith.constant 0 : i32
    %c0_i32_1 = arith.constant 0 : i32
    %c0_i32_2 = arith.constant 0 : i32
    return %c0_i32, %c0_i32_0, %c0_i32_1 : i32, i32, i32
  }
  func.func @transform_5(%arg0: i32) -> (i32, i32) {
    %c0_i32 = arith.constant 0 : i32
    %c0_i32_0 = arith.constant 0 : i32
    %c0_i32_1 = arith.constant 0 : i32
    return %c0_i32, %c0_i32_0 : i32, i32
  }
  func.func @transform_6(%arg0: i32) -> (i32, i32) {
    %c0_i32 = arith.constant 0 : i32
    %c0_i32_0 = arith.constant 0 : i32
    %c0_i32_1 = arith.constant 0 : i32
    return %c0_i32, %c0_i32_0 : i32, i32
  }
  func.func @transform_7(%arg0: i32) -> (i32, i32) {
    %c0_i32 = arith.constant 0 : i32
    %c0_i32_0 = arith.constant 0 : i32
    %c0_i32_1 = arith.constant 0 : i32
    return %c0_i32, %c0_i32_0 : i32, i32
  }
  func.func @transform_8(%arg0: i32) -> (i32, i32) {
    %c0_i32 = arith.constant 0 : i32
    %c0_i32_0 = arith.constant 0 : i32
    %c0_i32_1 = arith.constant 0 : i32
    return %c0_i32, %c0_i32_0 : i32, i32
  }
  func.func @transform_9(%arg0: i32) -> (i32, i32) {
    %c0_i32 = arith.constant 0 : i32
    %c0_i32_0 = arith.constant 0 : i32
    %c0_i32_1 = arith.constant 0 : i32
    return %c0_i32, %c0_i32_0 : i32, i32
  }
  func.func @transform_10(%arg0: i32) -> (i32, i32) {
    %c0_i32 = arith.constant 0 : i32
    %c0_i32_0 = arith.constant 0 : i32
    %c0_i32_1 = arith.constant 0 : i32
    return %c0_i32, %c0_i32_0 : i32, i32
  }
  func.func @transform_11(%arg0: i32) -> (i32, i32) {
    %c0_i32 = arith.constant 0 : i32
    %c0_i32_0 = arith.constant 0 : i32
    %c0_i32_1 = arith.constant 0 : i32
    return %c0_i32, %c0_i32_0 : i32, i32
  }
  func.func @transform_12(%arg0: i32) -> (i32, i32) {
    %c0_i32 = arith.constant 0 : i32
    %c0_i32_0 = arith.constant 0 : i32
    %c0_i32_1 = arith.constant 0 : i32
    return %c0_i32, %c0_i32_0 : i32, i32
  }
  func.func @transform_13(%arg0: i32) -> (i32, i32) {
    %c0_i32 = arith.constant 0 : i32
    %c0_i32_0 = arith.constant 0 : i32
    %c0_i32_1 = arith.constant 0 : i32
    return %c0_i32, %c0_i32_0 : i32, i32
  }
  func.func @transform_14(%arg0: i32) -> (i32, i32) {
    %c0_i32 = arith.constant 0 : i32
    %c0_i32_0 = arith.constant 0 : i32
    %c0_i32_1 = arith.constant 0 : i32
    return %c0_i32, %c0_i32_0 : i32, i32
  }
}

</mosaic_0001>

<bundles_post_ra>
// kernel: _decoder_step_impl.3
= control target key start
LH: loop header
LB: loop body
LE: loop exit
PB: predicated region body
PF: predicated region fallthrough
CT: control target
= control target key end

     0   :  { %v374_v0 = vmov 0.0   ;;  %vm375_vm0 = vmmov 0   ;;  %vm77_vm1 = vcmask 523264   ;;  %vm226_vm2 = vcmask 261120   ;;  %s476_s3 = inlined_call_operand.vmem [shape: bf16[128,128], index: 3, kind: input, shape index: {}]   ;;  %s477_s4 = inlined_call_operand.vmem [shape: bf16[64,128], index: 4, kind: input, shape index: {}]   ;;  %s478_s5 = inlined_call_operand.vmem [shape: bf16[32,128], index: 5, kind: input, shape index: {}]   ;;  %s479_s1 = inlined_call_operand.vmem [shape: bf16[8,64], index: 1, kind: input, shape index: {}]   ;;  %s480_s2 = inlined_call_operand.vmem [shape: bf16[8,32], index: 2, kind: input, shape index: {}]   ;;  %s481_s0 = inlined_call_operand.vmem [shape: bf16[8,128], index: 0, kind: input, shape index: {}]   ;;  %s482_s6 = inlined_call_operand.vmem [shape: f32[1,128], index: 6, kind: input, shape index: {}]   ;;  %s483_s7 = inlined_call_operand.vmem [shape: f32[8,128], index: 7, kind: output, shape index: {}]  }
   0x1   :  { %330 = vmatprep.subr.bf16.mxu1 %v374_v0  ;;  %v360_v1 = vld [vmem:[%s476_s3] sm:$0xff]   ;;  %318 = vmatprep.subr.bf16.mxu0 %v374_v0  ;;  %v361_v2 = vld [vmem:[%s476_s3 + $0x8] sm:$0xff]   ;;  %v363_v5 = vld [vmem:[%s476_s3 + $0x10] sm:$0xff]  }
   0x2   :  { %326 = vmatprep.mubr.msk.bf16.mxu0 %vm375_vm0, %v374_v0  ;;  %346 = vmatprep.mubr.msk.bf16.mxu1 %vm375_vm0, %v374_v0  ;;  %v362_v3 = vld [vmem:[%s477_s4] sm:$0xff]   ;;  %v364_v4 = vld [vmem:[%s477_s4 + $0x8] sm:$0xff]   ;;  %v366_v6 = vld [vmem:[%s477_s4 + $0x10] sm:$0xff]  }
   0x3   :  { %331 = vmatpush3.bf16.msra.mxu1 %v360_v1  ;;  %319 = vmatpush3.bf16.msra.mxu0 %v362_v3  ;;  %v365_v7 = vld [vmem:[%s476_s3 + $0x18] sm:$0xff]   ;;  %v367_v9 = vld [vmem:[%s476_s3 + $0x20] sm:$0xff]   ;;  %v369_v12 = vld [vmem:[%s476_s3 + $0x28] sm:$0xff]  }
   0x4   :  { %332 = vmatprep.subr.bf16.mxu1 %v374_v0  ;;  %320 = vmatprep.subr.bf16.mxu0 %v374_v0  ;;  %v368_v8 = vld [vmem:[%s477_s4 + $0x18] sm:$0xff]   ;;  %v44_v10 = vld [vmem:[%s479_s1] sm:$0xf]  ;;  %v372_v13 = vld [vmem:[%s478_s5 + $0x8] sm:$0xff]  }
   0x5   :  { %v370_v11 = vld [vmem:[%s478_s5] sm:$0xff]   ;;  %v371_v14 = vld [vmem:[%s476_s3 + $0x30] sm:$0xff]   ;;  %v373_v16 = vld [vmem:[%s476_s3 + $0x38] sm:$0xff]  }
   0x6   :  { %v209_v15 = vld [vmem:[%s480_s2] sm:$0xf] }
   0x7   :  { %333 = vmatpush3.bf16.msra.mxu1 %v361_v2  ;;  %321 = vmatpush3.bf16.msra.mxu0 %v364_v4  ;;  %v27_v17 = vld [vmem:[%s481_s0] sm:$0xf] }
   0x8   :  { %334 = vmatprep.subr.bf16.mxu1 %v374_v0  ;;  %322 = vmatprep.subr.bf16.mxu0 %v374_v0  ;;  %v300_v29 = vld [vmem:[%s482_s6] ss:$0 sm:$0xff] }
   0xb   :  { %335 = vmatpush3.bf16.msra.mxu1 %v363_v5  ;;  %323 = vmatpush3.bf16.msra.mxu0 %v366_v6 }
   0xc   :  { %336 = vmatprep.subr.bf16.mxu1 %v374_v0  ;;  %324 = vmatprep.subr.bf16.mxu0 %v374_v0 }
   0xf   :  { %337 = vmatpush3.bf16.msra.mxu1 %v365_v7  ;;  %325 = vmatpush3.bf16.msra.mxu0 %v368_v8 }
  0x10   :  { %338 = vmatprep.subr.bf16.mxu1 %v374_v0  ;;  %350 = vmatprep.subr.bf16.mxu0 %v374_v0 }
  0x12   :  { %327 = vmatmul.mubr.msk.bf16.vlgmr.msra.gmra.mrb[0].mxu0 %vm77_vm1, %v44_v10 }
  0x13   :  { %339 = vmatpush3.bf16.msra.mxu1 %v367_v9  ;;  %351 = vmatpush3.bf16.msra.mxu0 %v370_v11 }
  0x14   :  { %340 = vmatprep.subr.bf16.mxu1 %v374_v0  ;;  %354 = vmatprep.mubr.msk.bf16.mxu0 %vm375_vm0, %v374_v0 }
  0x15   :  { %352 = vmatprep.subr.bf16.mxu0 %v374_v0 }
  0x17   :  { %341 = vmatpush3.bf16.msra.mxu1 %v369_v12  ;;  %353 = vmatpush3.bf16.msra.mxu0 %v372_v13 }
  0x18   :  { %342 = vmatprep.subr.bf16.mxu1 %v374_v0 }
  0x1a   :  { %355 = vmatmul.mubr.msk.bf16.vlgmr.msra.gmra.mrb[4].mxu0 %vm226_vm2, %v209_v15 }
  0x1b   :  { %343 = vmatpush3.bf16.msra.mxu1 %v371_v14 }
  0x1c   :  { %344 = vmatprep.subr.bf16.mxu1 %v374_v0 }
  0x1f   :  { %345 = vmatpush3.bf16.msra.mxu1 %v373_v16 }
  0x22   :  { %347 = vmatmul.mubr.bf16.vlgmr.msra.gmra.mrb[0].mxu1 %v27_v17 }
  0xe5   :  { %v115_v18 = vpop.f32.mrb[0].mxu0 }
  0xe6   :  { %v328_v19 = vpop.f32.mrb[1].mxu0 }
  0xe7   :  { %v118_v20 = vpop.f32.mrb[2].mxu0 }
  0xe8   :  { %v329_v21 = vpop.f32.mrb[3].mxu0 }
  0xed   :  { %v264_v22 = vpop.f32.mrb[4].mxu0 }
  0xee   :  { %v356_v23 = vpop.f32.mrb[5].mxu0 }
  0xef   :  { %v267_v24 = vpop.f32.mrb[6].mxu0 }
  0xf0   :  { %v357_v25 = vpop.f32.mrb[7].mxu0 }
  0xf5   :  { %v203_v26 = vpop.f32.mrb[0].mxu1 }
  0xf6   :  { %v204_v27 = vadd.f32 %v203_v26, %v115_v18  ;;  %v348_v28 = vpop.f32.mrb[1].mxu1 }
  0xf7   :  { %v206_v30 = vpop.f32.mrb[2].mxu1 }
  0xf8   :  { %v270_v31 = vadd.f32 %v264_v22, %v204_v27  ;;  %v349_v32 = vpop.f32.mrb[3].mxu1 }
  0xfa   :  { %v278_v33 = vadd.f32 %v300_v29, %v270_v31 }
  0xfc   :  { %279 = vst [vmem:[%s483_s7] sm:$0xff] %v278_v33 }

// kernel: _decoder_step_impl.2
= control target key start
LH: loop header
LB: loop body
LE: loop exit
PB: predicated region body
PF: predicated region fallthrough
CT: control target
= control target key end

     0   :  { %20 = vsyncpa [#allocation3], 0  ;;  %s1905_s0 = inlined_call_operand.vmem [shape: f32[8,32], index: 0, kind: input, shape index: {}]   ;;  %s1906_s1 = inlined_call_operand.vmem [shape: f32[8,128], index: 1, kind: input, shape index: {}]   ;;  %s1907_s2 = inlined_call_operand.vmem [shape: f32[8,128], index: 2, kind: input, shape index: {}]   ;;  %s1908_s3 = inlined_call_operand.vmem [shape: f32[8,8,128], index: 3, kind: input, shape index: {}]   ;;  %s1909_s4 = inlined_call_operand.hbm [shape: bf16[8,8,64], index: 4, kind: input, shape index: {}]   ;;  %s1910_s5 = inlined_call_operand.hbm [shape: f32[8,8], index: 5, kind: input, shape index: {}]   ;;  %s1911_s6 = inlined_call_operand.hbm [shape: bf16[128,128], index: 6, kind: input, shape index: {}]   ;;  %s1912_s7 = inlined_call_operand.hbm [shape: f32[1,128], index: 7, kind: input, shape index: {}]   ;;  %s1913_s8 = inlined_call_operand.hbm [shape: bf16[32,512], index: 8, kind: input, shape index: {}]   ;;  %s1914_s9 = inlined_call_operand.vmem [shape: bf16[64,512], index: 9, kind: input, shape index: {}]   ;;  %s1915_s10 = inlined_call_operand.hbm [shape: bf16[128,512], index: 10, kind: input, shape index: {}]   ;;  %s1916_s11 = inlined_call_operand.hbm [shape: f32[1,512], index: 11, kind: input, shape index: {}]   ;;  %s1917_s12 = inlined_call_operand.vmem [shape: f32[8,128], index: 12, kind: output, shape index: {0}]   ;;  %s1918_s13 = inlined_call_operand.vmem [shape: f32[8,128], index: 13, kind: output, shape index: {1}]   ;;  %s1919_s14 = inlined_call_operand.vmem [shape: f32[8,64], index: 14, kind: output, shape index: {2}]  }
   0x1   :  { %21 = vsyncpa [#allocation5], 0 }
   0x2   :  { %22 = vsyncpa [#allocation8], 0 }
   0x3   :  { %23 = vsyncpa [#allocation11], 0  ;;  %s1561_s29 = smov [#allocation4]   ;;  %s1562_s15 = smov [#allocation7]  }
   0x4   :  { %s50_s30 = sshll.u32 %s1561_s29, 4  ;;  %s72_s16 = sshll.u32 %s1562_s15, 4  ;;  %s51_s30 = int_to_ptr.vmem [resolvable:$true] %s50_s30  ;;  %s73_s16 = int_to_ptr.vmem [resolvable:$true] %s72_s16 }
   0x5   :  { %s1399_s19 = scalar_lea.hbm %s1910_s5, 128 }
   0x6   :  { %p1400_p0 = scmp.ne.s32.totalorder %s1910_s5, %s1399_s19  ;;  %p1403_p1 = scmp.lt.u32.totalorder %s1399_s19, %s1910_s5 }
   0x8   :  { %p1405_p2 = pnand %p1403_p1, %p1400_p0 }
   0xa   :  { %1408 = shalt.err (!%p1405_p2)
}
   0xb   :  { %s1409_s24 = scalar_lea.vmem %s51_s30, 128  ;;  %p1414_p4 = scmp.lt.s32.totalorder %s51_s30, %s51_s30 }
   0xc   :  { %p1410_p3 = scmp.ne.s32.totalorder %s51_s30, %s1409_s24  ;;  %p1415_p5 = scmp.lt.s32.totalorder %s1409_s24, %s1409_s24 }
   0xe   :  { %p1416_p6 = por %p1415_p5, %p1414_p4 }
  0x10   :  { %p1417_p7 = pnand %p1416_p6, %p1410_p3 }
  0x12   :  { %1420 = shalt.err (!%p1417_p7)
}
  0x13   :  { %53 = dma.hbm_to_vmem [thread:$0]  %s1910_s5, 128, %s51_s30, [#allocation5]  }
  0x14   :  { %s1421_s29 = scalar_lea.hbm %s1912_s7, 16 }
  0x15   :  { %p1422_p8 = scmp.ne.s32.totalorder %s1912_s7, %s1421_s29  ;;  %p1425_p9 = scmp.lt.u32.totalorder %s1421_s29, %s1912_s7 }
  0x17   :  { %p1427_p10 = pnand %p1425_p9, %p1422_p8 }
  0x19   :  { %1430 = shalt.err (!%p1427_p10)
}
  0x1a   :  { %s1431_s20 = scalar_lea.vmem %s73_s16, 16  ;;  %s1435_s21 = scalar_lea.vmem %s73_s16, 32 }
  0x1b   :  { %p1432_p11 = scmp.ne.s32.totalorder %s73_s16, %s1431_s20  ;;  %p1436_p12 = scmp.lt.s32.totalorder %s73_s16, %s73_s16 }
  0x1c   :  { %p1437_p13 = scmp.lt.s32.totalorder %s1435_s21, %s1431_s20 }
  0x1e   :  { %p1438_p0 = por %p1437_p13, %p1436_p12 }
  0x20   :  { %p1439_p1 = pnand %p1438_p0, %p1432_p11 }
  0x22   :  { %1442 = shalt.err (!%p1439_p1)
}
  0x23   :  { %75 = dma.hbm_to_vmem [thread:$0]  %s1912_s7, 16, %s73_s16, [#allocation8]  }
  0x24   :  { %s1563_s22 = smov [#allocation10]   ;;  %s1564_s24 = smov [#allocation2]  }
  0x25   :  { %s95_s23 = sshll.u32 %s1563_s22, 4  ;;  %s37_s25 = sshll.u32 %s1564_s24, 4  ;;  %s96_s23 = int_to_ptr.vmem [resolvable:$true] %s95_s23  ;;  %s1674_s25 = int_to_ptr.vmem [resolvable:$true] %s37_s25 }
  0x26   :  { %s1443_s28 = scalar_lea.hbm %s1915_s10, 4096 }
  0x27   :  { %p1444_p2 = scmp.ne.s32.totalorder %s1915_s10, %s1443_s28  ;;  %p1447_p3 = scmp.lt.u32.totalorder %s1443_s28, %s1915_s10 }
  0x29   :  { %p1449_p4 = pnand %p1447_p3, %p1444_p2 }
  0x2b   :  { %1452 = shalt.err (!%p1449_p4)
}
  0x2c   :  { %s1453_s7 = scalar_lea.vmem %s96_s23, 4096  ;;  %p1458_p6 = scmp.lt.s32.totalorder %s96_s23, %s96_s23 }
  0x2d   :  { %p1454_p5 = scmp.ne.s32.totalorder %s96_s23, %s1453_s7  ;;  %p1459_p7 = scmp.lt.s32.totalorder %s1453_s7, %s1453_s7 }
  0x2f   :  { %p1460_p8 = por %p1459_p7, %p1458_p6 }
  0x31   :  { %p1461_p9 = pnand %p1460_p8, %p1454_p5 }
  0x33   :  { %1464 = shalt.err (!%p1461_p9)
}
  0x34   :  { %s1565_s16 = smov 256   ;;  %s1566_s19 = smov 16  }
  0x35   :  { %101 = dma.hbm_to_vmem [thread:$0]  %s1915_s10, 4096, %s96_s23, [#allocation11], %s1565_s16, %s1565_s16, %s1566_s19  }
  0x36   :  { %s1465_s22 = scalar_lea.hbm %s1909_s4, 512 }
  0x37   :  { %p1466_p10 = scmp.ne.s32.totalorder %s1909_s4, %s1465_s22  ;;  %p1469_p11 = scmp.lt.u32.totalorder %s1465_s22, %s1909_s4 }
  0x39   :  { %p1471_p12 = pnand %p1469_p11, %p1466_p10 }
  0x3b   :  { %1474 = shalt.err (!%p1471_p12)
}
  0x3c   :  { %s1475_s29 = scalar_lea.vmem %s1674_s25, 512  ;;  %p1480_p0 = scmp.lt.s32.totalorder %s1674_s25, %s1674_s25 }
  0x3d   :  { %p1476_p13 = scmp.ne.s32.totalorder %s1674_s25, %s1475_s29  ;;  %p1481_p1 = scmp.lt.s32.totalorder %s1475_s29, %s1475_s29 }
  0x3f   :  { %p1482_p2 = por %p1481_p1, %p1480_p0 }
  0x41   :  { %p1483_p3 = pnand %p1482_p2, %p1476_p13 }
  0x43   :  { %1486 = shalt.err (!%p1483_p3)
}
  0x44   :  { %s1567_s10 = smov 64   ;;  %s1568_s23 = smov 4  }
  0x45   :  { %43 = dma.hbm_to_vmem [thread:$0]  %s1909_s4, 512, %s1674_s25, [#allocation3], %s1567_s10, %s1567_s10, %s1568_s23  }
  0x46   :  { %s1569_s18 = smov [#allocation6]   ;;  %s1570_s20 = smov [#allocation9]  }
  0x47   :  { %s59_s7 = sshll.u32 %s1569_s18, 4  ;;  %s81_s21 = sshll.u32 %s1570_s20, 4  ;;  %s60_s7 = int_to_ptr.vmem [resolvable:$true] %s59_s7  ;;  %s1708_s21 = int_to_ptr.vmem [resolvable:$true] %s81_s21 }
  0x48   :  { %s1487_s22 = scalar_lea.hbm %s1911_s6, 1024 }
  0x49   :  { %p1488_p4 = scmp.ne.s32.totalorder %s1911_s6, %s1487_s22  ;;  %p1491_p5 = scmp.lt.u32.totalorder %s1487_s22, %s1911_s6 }
  0x4b   :  { %p1493_p6 = pnand %p1491_p5, %p1488_p4 }
  0x4d   :  { %1496 = shalt.err (!%p1493_p6)
}
  0x4e   :  { %s1497_s4 = scalar_lea.vmem %s60_s7, 1024  ;;  %p1502_p8 = scmp.lt.s32.totalorder %s60_s7, %s60_s7 }
  0x4f   :  { %p1498_p7 = scmp.ne.s32.totalorder %s60_s7, %s1497_s4  ;;  %p1503_p9 = scmp.lt.s32.totalorder %s1497_s4, %s1497_s4 }
  0x51   :  { %p1504_p10 = por %p1503_p9, %p1502_p8 }
  0x53   :  { %p1505_p11 = pnand %p1504_p10, %p1498_p7 }
  0x55   :  { %1508 = shalt.err (!%p1505_p11)
}
  0x56   :  { %65 = dma.hbm_to_vmem [thread:$0]  %s1911_s6, 1024, %s60_s7, [#allocation5], %s1567_s10, %s1567_s10, %s1568_s23  }
  0x57   :  { %s1509_s18 = scalar_lea.hbm %s1913_s8, 1024 }
  0x58   :  { %p1510_p12 = scmp.ne.s32.totalorder %s1913_s8, %s1509_s18  ;;  %p1513_p13 = scmp.lt.u32.totalorder %s1509_s18, %s1913_s8 }
  0x5a   :  { %p1515_p0 = pnand %p1513_p13, %p1510_p12 }
  0x5c   :  { %1518 = shalt.err (!%p1515_p0)
}
  0x5d   :  { %s1519_s24 = scalar_lea.vmem %s1708_s21, 1024  ;;  %p1524_p2 = scmp.lt.s32.totalorder %s1708_s21, %s1708_s21 }
  0x5e   :  { %p1520_p1 = scmp.ne.s32.totalorder %s1708_s21, %s1519_s24  ;;  %p1525_p3 = scmp.lt.s32.totalorder %s1519_s24, %s1519_s24 }
  0x60   :  { %p1526_p4 = por %p1525_p3, %p1524_p2 }
  0x62   :  { %p1527_p5 = pnand %p1526_p4, %p1520_p1 }
  0x64   :  { %1530 = shalt.err (!%p1527_p5)
}
  0x65   :  { %87 = dma.hbm_to_vmem [thread:$0]  %s1913_s8, 1024, %s1708_s21, [#allocation8], %s1565_s16, %s1565_s16, %s1566_s19  }
  0x66   :  { %s1571_s23 = smov [#allocation12]   ;;  %s1531_s28 = scalar_lea.hbm %s1916_s11, 64 }
  0x67   :  { %s108_s7 = sshll.u32 %s1571_s23, 4  ;;  %p1532_p6 = scmp.ne.s32.totalorder %s1916_s11, %s1531_s28  ;;  %s109_s7 = int_to_ptr.vmem [resolvable:$true] %s108_s7 }
  0x68   :  { %p1535_p7 = scmp.lt.u32.totalorder %s1531_s28, %s1916_s11 }
  0x6a   :  { %p1537_p8 = pnand %p1535_p7, %p1532_p6 }
  0x6c   :  { %1540 = shalt.err (!%p1537_p8)
}
  0x6d   :  { %s1541_s17 = scalar_lea.vmem %s109_s7, 64  ;;  %p1546_p10 = scmp.lt.s32.totalorder %s109_s7, %s109_s7 }
  0x6e   :  { %p1542_p9 = scmp.ne.s32.totalorder %s109_s7, %s1541_s17  ;;  %p1547_p11 = scmp.lt.s32.totalorder %s1541_s17, %s1541_s17 }
  0x70   :  { %p1548_p12 = por %p1547_p11, %p1546_p10 }
  0x72   :  { %p1549_p13 = pnand %p1548_p12, %p1542_p9 }
  0x74   :  { %1552 = shalt.err (!%p1549_p13)
}
  0x75   :  { %111 = dma.hbm_to_vmem [thread:$0]  %s1916_s11, 64, %s109_s7, [#allocation11]  }
  0x76   :  { %1553 = dma.done.wait [#allocation3], 512  }
  0x77   :  { %1554 = vsyncadd [#allocation3], 4294966784 }
  0x78   :  { %1555 = dma.done.wait [#allocation5], 1152  }
  0x79   :  { %1556 = vsyncadd [#allocation5], 4294966144 }
  0x7a   :  { %1557 = dma.done.wait [#allocation8], 1040  }
  0x7b   :  { %1558 = vsyncadd [#allocation8], 4294966256 }
  0x7c   :  { %1559 = dma.done.wait [#allocation11], 4160  }
  0x7d   :  { %1560 = vsyncadd [#allocation11], 4294963136  ;;  %v1572_v0 = vmov 0.0   ;;  %vm1573_vm0 = vmmov 0   ;;  %v1271_v1 = vld [vmem:[#allocation6] sm:$0xff]   ;;  %v1272_v2 = vld [vmem:[#allocation6 + $0x8] sm:$0xff]   ;;  %v307_v59 = vlaneseq }
  0x7e   :  { %1237 = vmatprep.subr.bf16.mxu0 %v1572_v0  ;;  %1253 = vmatprep.mubr.msk.bf16.mxu0 %vm1573_vm0, %v1572_v0  ;;  %v1273_v3 = vld [vmem:[#allocation6 + $0x10] sm:$0xff]   ;;  %v1274_v4 = vld [vmem:[#allocation6 + $0x18] sm:$0xff]   ;;  %v1275_v5 = vld [vmem:[#allocation6 + $0x20] sm:$0xff]   ;;  %v1574_v51 = vmov 0   ;;  %vm704_vm1 = vcmask 261120   ;;  %vm341_vm2 = vcmask 1041409  }
  0x7f   :  { %1238 = vmatpush3.bf16.msra.mxu0 %v1271_v1  ;;  %v1276_v6 = vld [vmem:[#allocation6 + $0x28] sm:$0xff]   ;;  %v1277_v7 = vld [vmem:[#allocation6 + $0x30] sm:$0xff]   ;;  %v1278_v8 = vld [vmem:[#allocation6 + $0x38] sm:$0xff]   ;;  %614 = vmatprep.mubr.bf16.mxu1 %v1574_v51  ;;  %v308_v60 = vand.u32 127, %v307_v59  ;;  %v1794_v61 = vshrl.u32 %v307_v59, 7  ;;  %vm343_vm3 = vcmask 1042434  }
  0x80   :  { %1239 = vmatprep.subr.bf16.mxu0 %v1572_v0  ;;  %v135_v9 = vld [vmem:[%s1906_s1] sm:$0xff]  ;;  %v244_v11 = vld [vmem:[%s1908_s3 + $0x10] sm:$0xff]  ;;  %v245_v13 = vld [vmem:[%s1908_s3 + $0x18] sm:$0xff]  ;;  %vm345_vm4 = vcmask 1043459   ;;  %vm347_vm5 = vcmask 1044484   ;;  %vm349_vm6 = vcmask 1045509  }
  0x81   :  { %v1757_v10 = vpack.c.bf16 %v135_v9, %v135_v9  ;;  %v242_v12 = vld [vmem:[%s1908_s3] sm:$0xff]  ;;  %v243_v14 = vld [vmem:[%s1908_s3 + $0x8] sm:$0xff]  ;;  %v249_v32 = vld [vmem:[%s1908_s3 + $0x38] sm:$0xff]  ;;  %vm351_vm7 = vcmask 1046534   ;;  %vm353_vm8 = vcmask 1047559   ;;  %vm357_vm10 = vcmask 64512  }
  0x82   :  { %v1145_v16 = vld [vmem:[#allocation7] ss:$0 sm:$0xff]  ;;  %v246_v27 = vld [vmem:[%s1908_s3 + $0x20] sm:$0xff]  ;;  %v248_v33 = vld [vmem:[%s1908_s3 + $0x30] sm:$0xff]  ;;  %vm457_vm11 = vcmask 523264  }
  0x83   :  { %1240 = vmatpush3.bf16.msra.mxu0 %v1272_v2  ;;  %v247_v23 = vld [vmem:[%s1908_s3 + $0x28] sm:$0xff]  ;;  %v134_v53 = vld [vmem:[%s1905_s0] sm:$0xff] }
  0x84   :  { %1241 = vmatprep.subr.bf16.mxu0 %v1572_v0  ;;  %v1279_v48 = vld [vmem:[#allocation9] ss:$16 sps:$4 sm:$0xff]   ;;  %v1281_v49 = vld [vmem:[#allocation9 + $0x4] ss:$16 sps:$4 sm:$0xff]   ;;  %v1789_v55 = vpack.c.bf16 %v134_v53, %v134_v53 }
  0x85   :  { %v1284_v50 = vld [vmem:[#allocation9 + $0x24] ss:$16 sps:$4 sm:$0xff]   ;;  %v1282_v52 = vld [vmem:[#allocation9 + $0x20] ss:$16 sps:$4 sm:$0xff]  }
  0x86   :  { %v1287_v54 = vld [vmem:[#allocation10 + $0x4] ss:$16 sps:$4 sm:$0xff]   ;;  %v1285_v56 = vld [vmem:[#allocation10] ss:$16 sps:$4 sm:$0xff]  }
  0x87   :  { %1242 = vmatpush3.bf16.msra.mxu0 %v1273_v3  ;;  %v1290_v57 = vld [vmem:[#allocation10 + $0x24] ss:$16 sps:$4 sm:$0xff]   ;;  %v1288_v58 = vld [vmem:[#allocation10 + $0x20] ss:$16 sps:$4 sm:$0xff]  }
  0x88   :  { %1243 = vmatprep.subr.bf16.mxu0 %v1572_v0  ;;  %v1302_v59 = vld [vmem:[#allocation10 + $0x84] ss:$16 sps:$4 sm:$0xff]  }
  0x8b   :  { %1244 = vmatpush3.bf16.msra.mxu0 %v1274_v4 }
  0x8c   :  { %1245 = vmatprep.subr.bf16.mxu0 %v1572_v0 }
  0x8f   :  { %1246 = vmatpush3.bf16.msra.mxu0 %v1275_v5 }
  0x90   :  { %1247 = vmatprep.subr.bf16.mxu0 %v1572_v0 }
  0x93   :  { %1248 = vmatpush3.bf16.msra.mxu0 %v1276_v6 }
  0x94   :  { %1249 = vmatprep.subr.bf16.mxu0 %v1572_v0 }
  0x97   :  { %1250 = vmatpush3.bf16.msra.mxu0 %v1277_v7 }
  0x98   :  { %1251 = vmatprep.subr.bf16.mxu0 %v1572_v0  ;;  %v311_v0 = vsub.s32 %v308_v60, %v1794_v61  ;;  %v1303_v60 = vld [vmem:[%s1914_s9 + $0x24] ss:$16 sps:$4 sm:$0xff]  }
  0x9b   :  { %1252 = vmatpush3.bf16.msra.mxu0 %v1278_v8 }
  0x9c   :  { %708 = vmatprep.subr.bf16.mxu0 %v1281_v49  ;;  %v1297_v49 = vld [vmem:[%s1914_s9 + $0x4] ss:$16 sps:$4 sm:$0xff]  }
  0x9d   :  { %582 = vmatprep.subr.bf16.mxu1 %v1297_v49 }
  0x9e   :  { %1254 = vmatmul.mubr.bf16.vlgmr.msra.gmra.mrb[0].mxu0 %v1757_v10 }
  0x9f   :  { %740 = vmatprep.mubr.bf16.mxu0 %v1574_v51  ;;  %709 = vmatpush1.bf16.msra.mxu0 %v1279_v48 }
  0xa0   :  { %710 = vmatprep.subr.bf16.mxu0 %v1284_v50  ;;  %v1299_v50 = vld [vmem:[%s1914_s9] ss:$16 sps:$4 sm:$0xff]  }
  0xa1   :  { %583 = vmatpush1.bf16.msra.mxu1 %v1299_v50 }
  0xa2   :  { %584 = vmatprep.subr.bf16.mxu1 %v1303_v60 }
  0xa3   :  { %711 = vmatpush1.bf16.msra.mxu0 %v1282_v52 }
  0xa4   :  { %982 = vmatprep.subr.bf16.mxu0 %v1287_v54 }
  0xa6   :  { %1172 = vmatmul.mubr.msk.bf16.vlgmr.msra.gmra.mrb[4].mxu0 %vm704_vm1, %v1789_v55 }
  0xa7   :  { %983 = vmatpush1.bf16.msra.mxu0 %v1285_v56  ;;  %1014 = vmatprep.mubr.bf16.mxu0 %v1574_v51  ;;  %v409_v56 = vsub.s32 2, %v1794_v61 }
  0xa8   :  { %984 = vmatprep.subr.bf16.mxu0 %v1290_v57  ;;  %v423_v57 = vsub.s32 4, %v1794_v61 }
  0xab   :  { %985 = vmatpush1.bf16.msra.mxu0 %v1288_v58  ;;  %v1300_v58 = vld [vmem:[#allocation10 + $0x80] ss:$16 sps:$4 sm:$0xff]  }
 0x171   :  { %v236_v15 = vpop.f32.mrb[0].mxu0 }
 0x172   :  { %v1255_v17 = vpop.f32.mrb[1].mxu0  ;;  %v252_v18 = vadd.f32 %v244_v11, %v236_v15  ;;  %v250_v19 = vadd.f32 %v242_v12, %v236_v15  ;;  %v253_v20 = vadd.f32 %v245_v13, %v236_v15  ;;  %v251_v22 = vadd.f32 %v243_v14, %v236_v15 }
 0x173   :  { %v239_v21 = vpop.f32.mrb[2].mxu0  ;;  %v255_v29 = vadd.f32 %v247_v23, %v236_v15  ;;  %v254_v31 = vadd.f32 %v246_v27, %v236_v15  ;;  %v257_v35 = vadd.f32 %v249_v32, %v236_v15  ;;  %v256_v37 = vadd.f32 %v248_v33, %v236_v15  ;;  %v297_v17 = vld [vmem:[#allocation4] sm:$0xff] }
 0x174   :  { %v1256_v24 = vpop.f32.mrb[3].mxu0  ;;  %v267_v25 = vadd.f32 %v1145_v16, %v252_v18  ;;  %v265_v26 = vadd.f32 %v1145_v16, %v250_v19  ;;  %v268_v28 = vadd.f32 %v1145_v16, %v253_v20  ;;  %v266_v30 = vadd.f32 %v1145_v16, %v251_v22 }
 0x175   :  { %v270_v34 = vadd.f32 %v1145_v16, %v255_v29  ;;  %v269_v36 = vadd.f32 %v1145_v16, %v254_v31  ;;  %v272_v38 = vadd.f32 %v1145_v16, %v257_v35  ;;  %v271_v39 = vadd.f32 %v1145_v16, %v256_v37 }
 0x176   :  { %1363 = vtanh.f32 %v267_v25  ;;  %vm298_vm9 = vcmp.gt.f32.partialorder %v297_v17, 0.0  ;;  %v1320_v17 = vld [vmem:[#allocation10 + $0xe4] ss:$16 sps:$4 sm:$0xff]  }
 0x177   :  { %1365 = vtanh.f32 %v265_v26 }
 0x178   :  { %1367 = vtanh.f32 %v268_v28 }
 0x179   :  { %1369 = vtanh.f32 %v266_v30 }
 0x17a   :  { %1371 = vtanh.f32 %v270_v34 }
 0x17b   :  { %1373 = vtanh.f32 %v269_v36 }
 0x17c   :  { %1375 = vtanh.f32 %v272_v38 }
 0x17d   :  { %1377 = vtanh.f32 %v271_v39 }
 0x180   :  { %v1364_v40 = vpop.eup %1363 }
 0x181   :  { %v1366_v41 = vpop.eup %1365  ;;  %285 = vadd.xlane.f32.xlu1 %v1364_v40 }
 0x182   :  { %281 = vadd.xlane.f32.xlu0 %v1366_v41  ;;  %v1368_v42 = vpop.eup %1367 }
 0x183   :  { %v1370_v43 = vpop.eup %1369 }
 0x184   :  { %v1372_v44 = vpop.eup %1371 }
 0x185   :  { %287 = vadd.xlane.f32.xlu1 %v1368_v42  ;;  %v1374_v45 = vpop.eup %1373  ;;  %v1291_v42 = vld [vmem:[#allocation10 + $0x40] ss:$16 sps:$4 sm:$0xff]  }
 0x186   :  { %283 = vadd.xlane.f32.xlu0 %v1370_v43  ;;  %v1376_v46 = vpop.eup %1375  ;;  %v1293_v43 = vld [vmem:[#allocation10 + $0x44] ss:$16 sps:$4 sm:$0xff]  }
 0x187   :  { %v1378_v47 = vpop.eup %1377  ;;  %986 = vmatprep.subr.bf16.mxu0 %v1293_v43 }
 0x188   :  { %987 = vmatpush1.bf16.msra.mxu0 %v1291_v42  ;;  %v1227_v42 = vld [vmem:[#allocation2 + $0x18] sm:$0xff]  }
 0x189   :  { %291 = vadd.xlane.f32.xlu1 %v1372_v44  ;;  %v402_v44 = vsub.s32 1, %v1794_v61  ;;  %v1223_v50 = vunpack.c.l.bf16 %v1227_v42 }
 0x18a   :  { %289 = vadd.xlane.f32.xlu0 %v1374_v45  ;;  %v395_v45 = vsub.s32 0, %v1794_v61 }
 0x18d   :  { %295 = vadd.xlane.f32.xlu1 %v1376_v46  ;;  %v1294_v46 = vld [vmem:[#allocation10 + $0x60] ss:$16 sps:$4 sm:$0xff]  }
 0x18e   :  { %293 = vadd.xlane.f32.xlu0 %v1378_v47  ;;  %v1296_v47 = vld [vmem:[#allocation10 + $0x64] ss:$16 sps:$4 sm:$0xff]  }
 0x18f   :  { %988 = vmatprep.subr.bf16.mxu0 %v1296_v47 }
 0x190   :  { %989 = vmatpush1.bf16.msra.mxu0 %v1294_v46 }
 0x191   :  { %990 = vmatprep.subr.bf16.mxu0 %v1302_v59 }
 0x194   :  { %991 = vmatpush1.bf16.msra.mxu0 %v1300_v58 }
 0x20e   :  { %v286_v62 = vpop.xlane.xlu1 %285 }
 0x20f   :  { %v282_v63 = vpop.xlane.xlu0 %281  ;;  %v320_v5 = vrot.slane %v286_v62, %v311_v0  ;;  %v1305_v62 = vld [vmem:[%s1914_s9 + $0x20] ss:$16 sps:$4 sm:$0xff]  }
 0x210   :  { %v312_v3 = vrot.slane %v282_v63, %v311_v0  ;;  %v416_v63 = vsub.s32 3, %v1794_v61  ;;  %585 = vmatpush1.bf16.msra.mxu1 %v1305_v62 }
 0x212   :  { %v288_v1 = vpop.xlane.xlu1 %287 }
 0x213   :  { %v284_v2 = vpop.xlane.xlu0 %283  ;;  %v324_v6 = vrot.slane %v288_v1, %v311_v0 }
 0x214   :  { %v316_v4 = vrot.slane %v284_v2, %v311_v0 }
 0x216   :  { %v342_v7 = vsel %vm341_vm2, %v316_v4, %v312_v3  ;;  %v292_v8 = vpop.xlane.xlu1 %291  ;;  %v1306_v3 = vld [vmem:[#allocation10 + $0xa0] ss:$16 sps:$4 sm:$0xff]   ;;  %v1308_v4 = vld [vmem:[#allocation10 + $0xa4] ss:$16 sps:$4 sm:$0xff]  }
 0x217   :  { %v344_v9 = vsel %vm343_vm3, %v320_v5, %v342_v7  ;;  %v290_v11 = vpop.xlane.xlu0 %289  ;;  %v332_v14 = vrot.slane %v292_v8, %v311_v0  ;;  %v1309_v5 = vld [vmem:[%s1914_s9 + $0x44] ss:$16 sps:$4 sm:$0xff]   ;;  %992 = vmatprep.subr.bf16.mxu0 %v1308_v4 }
 0x218   :  { %v346_v12 = vsel %vm345_vm4, %v324_v6, %v344_v9  ;;  %v328_v13 = vrot.slane %v290_v11, %v311_v0  ;;  %v1311_v6 = vld [vmem:[%s1914_s9 + $0x40] ss:$16 sps:$4 sm:$0xff]   ;;  %586 = vmatprep.subr.bf16.mxu1 %v1309_v5  ;;  %v430_v9 = vsub.s32 5, %v1794_v61  ;;  %993 = vmatpush1.bf16.msra.mxu0 %v1306_v3  ;;  %v1312_v11 = vld [vmem:[#allocation10 + $0xc0] ss:$16 sps:$4 sm:$0xff]  }
 0x219   :  { %587 = vmatpush1.bf16.msra.mxu1 %v1311_v6 }
 0x21a   :  { %v348_v15 = vsel %vm347_vm5, %v328_v13, %v346_v12  ;;  %v296_v16 = vpop.xlane.xlu1 %295  ;;  %v1314_v12 = vld [vmem:[#allocation10 + $0xc4] ss:$16 sps:$4 sm:$0xff]   ;;  %v1315_v13 = vld [vmem:[%s1914_s9 + $0x64] ss:$16 sps:$4 sm:$0xff]  }
 0x21b   :  { %v340_v18 = vrot.slane %v296_v16, %v311_v0  ;;  %v294_v19 = vpop.xlane.xlu0 %293  ;;  %v350_v21 = vsel %vm349_vm6, %v332_v14, %v348_v15  ;;  %v1317_v14 = vld [vmem:[%s1914_s9 + $0x60] ss:$16 sps:$4 sm:$0xff]   ;;  %v444_v16 = vsub.s32 7, %v1794_v61  ;;  %994 = vmatprep.subr.bf16.mxu0 %v1314_v12  ;;  %588 = vmatprep.subr.bf16.mxu1 %v1315_v13  ;;  %v1321_v12 = vld [vmem:[%s1914_s9 + $0x8] ss:$16 sps:$4 sm:$0xff]  }
 0x21c   :  { %v336_v20 = vrot.slane %v294_v19, %v311_v0  ;;  %v437_v0 = vsub.s32 6, %v1794_v61  ;;  %995 = vmatpush1.bf16.msra.mxu0 %v1312_v11  ;;  %v1318_v19 = vld [vmem:[#allocation10 + $0xe0] ss:$16 sps:$4 sm:$0xff]  }
 0x21d   :  { %589 = vmatpush1.bf16.msra.mxu1 %v1317_v14  ;;  %996 = vmatprep.subr.bf16.mxu0 %v1320_v17  ;;  %v1326_v14 = vld [vmem:[%s1914_s9 + $0x2c] ss:$16 sps:$4 sm:$0xff]   ;;  %v1327_v17 = vld [vmem:[%s1914_s9 + $0x48] ss:$16 sps:$4 sm:$0xff]  }
 0x21e   :  { %v352_v22 = vsel %vm351_vm7, %v336_v20, %v350_v21  ;;  %v1210_v21 = vld [vmem:[#allocation2] sm:$0xff]  }
 0x21f   :  { %v354_v23 = vsel %vm353_vm8, %v340_v18, %v352_v22  ;;  %v1323_v18 = vld [vmem:[%s1914_s9 + $0xc] ss:$16 sps:$4 sm:$0xff]   ;;  %v1841_v22 = vpop.f32.mrb[4].mxu0 }
 0x220   :  { %v356_v24 = vsel %vm298_vm9, %v354_v23, -1e+10  ;;  %623 = vmatprep.subr.bf16.mxu1 %v1323_v18  ;;  %997 = vmatpush1.bf16.msra.mxu0 %v1318_v19  ;;  %v1843_v23 = vpop.f32.mrb[5].mxu0  ;;  %v1332_v18 = vld [vmem:[%s1914_s9 + $0x6c] ss:$16 sps:$4 sm:$0xff]  }
 0x221   :  { %v358_v25 = vsel %vm357_vm10, %v356_v24, -inf  ;;  %v1330_v19 = vld [vmem:[%s1914_s9 + $0x68] ss:$16 sps:$4 sm:$0xff]  }
 0x222   :  { %v359_v26 = vrot.slane %v358_v25, 4 }
 0x223   :  { %1015 = vmatmul.mubr.bf16.vlgmr.msra.gmra.mrb[8].mxu0 %v1757_v10 }
 0x224   :  { %v360_v27 = vmax.f32 %v358_v25, %v359_v26  ;;  %v1211_v25 = vunpack.c.l.bf16 %v1210_v21  ;;  %v746_v26 = vpop.f32.mrb[6].mxu0 }
 0x225   :  { %v1341_v26 = vld [vmem:[#allocation10 + $0xc] ss:$16 sps:$4 sm:$0xff]  }
 0x226   :  { %v361_v28 = vrot.slane %v360_v27, 2 }
 0x228   :  { %v362_v29 = vmax.f32 %v360_v27, %v361_v28  ;;  %v1225_v27 = vld [vmem:[#allocation2 + $0x8] sm:$0xff]   ;;  %v747_v28 = vpop.f32.mrb[7].mxu0 }
 0x229   :  { %v1344_v28 = vld [vmem:[#allocation10 + $0x2c] ss:$16 sps:$4 sm:$0xff]  }
 0x22a   :  { %v363_v30 = vrot.slane %v362_v29, 1 }
 0x22c   :  { %v364_v31 = vmax.f32 %v362_v29, %v363_v30 }
 0x22e   :  { %v365_v32 = vsub.f32 %v356_v24, %v364_v31  ;;  %v1212_v24 = vunpack.c.h.bf16 %v1210_v21  ;;  %v1333_v21 = vld [vmem:[#allocation9 + $0x8] ss:$16 sps:$4 sm:$0xff]  }
 0x230   :  { %v366_v33 = vmul.f32 1.442695, %v365_v32 }
 0x232   :  { %1379 = vpow2.f32 %v366_v33  ;;  %v1215_v33 = vunpack.c.l.bf16 %v1225_v27 }
 0x23c   :  { %v1380_v34 = vpop.eup %1379 }
 0x23d   :  { %v368_v35 = vsel %vm357_vm10, %v1380_v34, 0.0 }
 0x23e   :  { %v369_v36 = vrot.slane %v368_v35, 4 }
 0x240   :  { %v370_v37 = vadd.f32 %v369_v36, %v368_v35 }
 0x242   :  { %v371_v38 = vrot.slane %v370_v37, 2 }
 0x244   :  { %v372_v39 = vadd.f32 %v371_v38, %v370_v37  ;;  %v1216_v37 = vunpack.c.h.bf16 %v1225_v27  ;;  %v1339_v27 = vld [vmem:[#allocation10 + $0x8] ss:$16 sps:$4 sm:$0xff]  }
 0x246   :  { %v373_v40 = vrot.slane %v372_v39, 1 }
 0x248   :  { %v374_v41 = vadd.f32 %v373_v40, %v372_v39 }
 0x24a   :  { %1381 = vrcp.f32 %v374_v41 }
 0x254   :  { %v1382_v48 = vpop.eup %1381 }
 0x255   :  { %v376_v52 = vmul.f32 %v1382_v48, %v1380_v34  ;;  %v1226_v34 = vld [vmem:[#allocation2 + $0x10] sm:$0xff]  }
 0x256   :  { %v1219_v41 = vunpack.c.l.bf16 %v1226_v34 }
 0x257   :  { %v403_v53 = vrot.slane %v376_v52, %v402_v44  ;;  %v396_v54 = vrot.slane %v376_v52, %v395_v45  ;;  %v410_v1 = vrot.slane %v376_v52, %v409_v56  ;;  %v424_v2 = vrot.slane %v376_v52, %v423_v57 }
 0x258   :  { %v417_v7 = vrot.slane %v376_v52, %v416_v63  ;;  %v438_v8 = vrot.slane %v376_v52, %v437_v0  ;;  %v431_v15 = vrot.slane %v376_v52, %v430_v9  ;;  %v445_v20 = vrot.slane %v376_v52, %v444_v16  ;;  %v1329_v16 = vld [vmem:[%s1914_s9 + $0x4c] ss:$16 sps:$4 sm:$0xff]  }
 0x259   :  { %405 = vbcast.lane.b32.xlu1 %v403_v53, 256  ;;  %398 = vbcast.lane.b32.xlu0 %v396_v54, 256  ;;  %v1220_v52 = vunpack.c.h.bf16 %v1226_v34  ;;  %v1353_v34 = vld [vmem:[#allocation10 + $0x8c] ss:$16 sps:$4 sm:$0xff]  }
 0x25d   :  { %412 = vbcast.lane.b32.xlu1 %v410_v1, 256  ;;  %426 = vbcast.lane.b32.xlu0 %v424_v2, 256  ;;  %v1224_v1 = vunpack.c.h.bf16 %v1227_v42 }
 0x261   :  { %419 = vbcast.lane.b32.xlu1 %v417_v7, 256  ;;  %440 = vbcast.lane.b32.xlu0 %v438_v8, 256 }
 0x265   :  { %433 = vbcast.lane.b32.xlu1 %v431_v15, 256  ;;  %v1324_v15 = vld [vmem:[%s1914_s9 + $0x28] ss:$16 sps:$4 sm:$0xff]  }
 0x269   :  { %447 = vbcast.lane.b32.xlu1 %v445_v20, 256  ;;  %v1335_v20 = vld [vmem:[#allocation9 + $0xc] ss:$16 sps:$4 sm:$0xff]  }
 0x2cb   :  { %v406_v29 = vpop.permute.xlu1 %405  ;;  %v399_v30 = vpop.permute.xlu0 %398 }
 0x2cc   :  { %v450_v31 = vmul.f32 %v1212_v24, %v406_v29  ;;  %v449_v32 = vmul.f32 %v1211_v25, %v399_v30  ;;  %v1338_v24 = vld [vmem:[#allocation9 + $0x2c] ss:$16 sps:$4 sm:$0xff]   ;;  %v1336_v25 = vld [vmem:[#allocation9 + $0x28] ss:$16 sps:$4 sm:$0xff]  }
 0x2cd   :  { %v1342_v29 = vld [vmem:[#allocation10 + $0x28] ss:$16 sps:$4 sm:$0xff]   ;;  %v1347_v30 = vld [vmem:[#allocation10 + $0x4c] ss:$16 sps:$4 sm:$0xff]  }
 0x2ce   :  { %v459_v38 = vsel %vm457_vm11, %v450_v31, 0.0  ;;  %v458_v39 = vsel %vm457_vm11, %v449_v32, 0.0  ;;  %v1345_v31 = vld [vmem:[#allocation10 + $0x48] ss:$16 sps:$4 sm:$0xff]   ;;  %v1350_v32 = vld [vmem:[#allocation10 + $0x6c] ss:$16 sps:$4 sm:$0xff]  }
 0x2cf   :  { %v413_v35 = vpop.permute.xlu1 %412  ;;  %v427_v36 = vpop.permute.xlu0 %426  ;;  %v460_v46 = vadd.f32 %v459_v38, %v458_v39  ;;  %v1362_v38 = vld [vmem:[#allocation10 + $0xec] ss:$16 sps:$4 sm:$0xff]   ;;  %v1360_v39 = vld [vmem:[#allocation10 + $0xe8] ss:$16 sps:$4 sm:$0xff]  }
 0x2d0   :  { %v451_v40 = vmul.f32 %v1215_v33, %v413_v35  ;;  %v453_v48 = vmul.f32 %v1219_v41, %v427_v36  ;;  %v1348_v33 = vld [vmem:[#allocation10 + $0x68] ss:$16 sps:$4 sm:$0xff]   ;;  %v1356_v36 = vld [vmem:[#allocation10 + $0xac] ss:$16 sps:$4 sm:$0xff]  }
 0x2d1   :  { %v1351_v35 = vld [vmem:[#allocation10 + $0x88] ss:$16 sps:$4 sm:$0xff]  }
 0x2d2   :  { %v461_v43 = vsel %vm457_vm11, %v451_v40, 0.0  ;;  %v465_v60 = vsel %vm457_vm11, %v453_v48, 0.0 }
 0x2d3   :  { %v420_v47 = vpop.permute.xlu1 %419  ;;  %v462_v53 = vadd.f32 %v461_v43, %v460_v46  ;;  %v441_v54 = vpop.permute.xlu0 %440 }
 0x2d4   :  { %v452_v49 = vmul.f32 %v1216_v37, %v420_v47  ;;  %v455_v62 = vmul.f32 %v1223_v50, %v441_v54  ;;  %v1359_v37 = vld [vmem:[#allocation10 + $0xcc] ss:$16 sps:$4 sm:$0xff]  }
 0x2d6   :  { %v463_v57 = vsel %vm457_vm11, %v452_v49, 0.0  ;;  %v469_v6 = vsel %vm457_vm11, %v455_v62, 0.0 }
 0x2d7   :  { %v464_v58 = vadd.f32 %v463_v57, %v462_v53  ;;  %v434_v59 = vpop.permute.xlu1 %433 }
 0x2d8   :  { %v454_v0 = vmul.f32 %v1220_v52, %v434_v59 }
 0x2d9   :  { %v466_v2 = vadd.f32 %v465_v60, %v464_v58 }
 0x2da   :  { %v467_v3 = vsel %vm457_vm11, %v454_v0, 0.0 }
 0x2db   :  { %v468_v4 = vadd.f32 %v467_v3, %v466_v2  ;;  %v448_v5 = vpop.permute.xlu1 %447  ;;  %v1068_v3 = vld [vmem:[#allocation12] sm:$0xf] }
 0x2dc   :  { %v456_v7 = vmul.f32 %v1224_v1, %v448_v5 }
 0x2dd   :  { %v470_v8 = vadd.f32 %v469_v6, %v468_v4 }
 0x2de   :  { %v471_v9 = vsel %vm457_vm11, %v456_v7, 0.0 }
 0x2df   :  { %v472_v11 = vadd.f32 %v471_v9, %v470_v8 }
 0x2e1   :  { %v482_v13 = vpack.c.bf16 %v472_v11, %v472_v11  ;;  %1120 = vst.msk [vmem:[%s1919_s14] sm:$0xff] %vm457_vm11, %v472_v11 }
 0x2e3   :  { %1162 = vmatmul.mubr.msk.bf16.vlgmr.msra.gmra.mrb[0].mxu1 %vm457_vm11, %v482_v13 }
 0x2e4   :  { %624 = vmatpush1.bf16.msra.mxu1 %v1321_v12  ;;  %655 = vmatprep.mubr.bf16.mxu1 %v1574_v51 }
 0x2e5   :  { %625 = vmatprep.subr.bf16.mxu1 %v1326_v14 }
 0x2e8   :  { %626 = vmatpush1.bf16.msra.mxu1 %v1324_v15 }
 0x2e9   :  { %627 = vmatprep.subr.bf16.mxu1 %v1329_v16 }
 0x2ec   :  { %628 = vmatpush1.bf16.msra.mxu1 %v1327_v17 }
 0x2ed   :  { %629 = vmatprep.subr.bf16.mxu1 %v1332_v18 }
 0x2f0   :  { %630 = vmatpush1.bf16.msra.mxu1 %v1330_v19 }
 0x2f1   :  { %749 = vmatprep.subr.bf16.mxu1 %v1335_v20 }
 0x2f3   :  { %1163 = vmatmul.mubr.msk.bf16.vlgmr.msra.gmra.mrb[4].mxu1 %vm457_vm11, %v482_v13  ;;  %v1081_v13 = vrot.slane %v1068_v3, %v409_v56  ;;  %v136_v56 = vld [vmem:[%s1907_s2] sm:$0xff] }
 0x2f4   :  { %750 = vmatpush1.bf16.msra.mxu1 %v1333_v21  ;;  %781 = vmatprep.mubr.bf16.mxu1 %v1574_v51 }
 0x2f5   :  { %751 = vmatprep.subr.bf16.mxu1 %v1338_v24 }
 0x2f6   :  { %v1016_v40 = vpop.f32.mrb[8].mxu0 }
 0x2f7   :  { %v1018_v41 = vpop.f32.mrb[9].mxu0 }
 0x2f8   :  { %752 = vmatpush1.bf16.msra.mxu1 %v1336_v25  ;;  %v1020_v42 = vpop.f32.mrb[10].mxu0 }
 0x2f9   :  { %1023 = vmatprep.subr.bf16.mxu1 %v1341_v26  ;;  %v1021_v43 = vpop.f32.mrb[11].mxu0 }
 0x2fb   :  { %1173 = vmatmul.mubr.msk.bf16.vlgmr.msra.gmra.mrb[8].mxu1 %vm704_vm1, %v1789_v55  ;;  %v1354_v55 = vld [vmem:[#allocation10 + $0xa8] ss:$16 sps:$4 sm:$0xff]  }
 0x2fc   :  { %1024 = vmatpush1.bf16.msra.mxu1 %v1339_v27  ;;  %1055 = vmatprep.mubr.bf16.mxu1 %v1574_v51  ;;  %v1357_v51 = vld [vmem:[#allocation10 + $0xc8] ss:$16 sps:$4 sm:$0xff]  }
 0x2fd   :  { %1025 = vmatprep.subr.bf16.mxu1 %v1344_v28 }
 0x300   :  { %1026 = vmatpush1.bf16.msra.mxu1 %v1342_v29 }
 0x301   :  { %1027 = vmatprep.subr.bf16.mxu1 %v1347_v30 }
 0x304   :  { %1028 = vmatpush1.bf16.msra.mxu1 %v1345_v31 }
 0x305   :  { %1029 = vmatprep.subr.bf16.mxu1 %v1350_v32 }
 0x308   :  { %1030 = vmatpush1.bf16.msra.mxu1 %v1348_v33 }
 0x309   :  { %1031 = vmatprep.subr.bf16.mxu1 %v1353_v34 }
 0x30c   :  { %1032 = vmatpush1.bf16.msra.mxu1 %v1351_v35 }
 0x30d   :  { %1033 = vmatprep.subr.bf16.mxu1 %v1356_v36 }
 0x310   :  { %1034 = vmatpush1.bf16.msra.mxu1 %v1354_v55 }
 0x311   :  { %1035 = vmatprep.subr.bf16.mxu1 %v1359_v37 }
 0x314   :  { %1036 = vmatpush1.bf16.msra.mxu1 %v1357_v51 }
 0x315   :  { %1037 = vmatprep.subr.bf16.mxu1 %v1362_v38 }
 0x318   :  { %1038 = vmatpush1.bf16.msra.mxu1 %v1360_v39 }
 0x31b   :  { %1056 = vmatmul.mubr.bf16.vlgmr.msra.gmra.mrb[12].mxu1 %v1757_v10 }
 0x3b6   :  { %v616_v46 = vpop.f32.mrb[0].mxu1 }
 0x3b7   :  { %v743_v47 = vadd.f32 %v1841_v22, %v616_v46  ;;  %v618_v48 = vpop.f32.mrb[1].mxu1  ;;  %v1077_v22 = vrot.slane %v1068_v3, %v402_v44  ;;  %v1085_v44 = vrot.slane %v1068_v3, %v416_v63 }
 0x3b8   :  { %v745_v49 = vadd.f32 %v1843_v23, %v618_v48  ;;  %v620_v50 = vpop.f32.mrb[2].mxu1  ;;  %v1073_v23 = vrot.slane %v1068_v3, %v395_v45 }
 0x3b9   :  { %v1064_v52 = vadd.f32 %v1016_v40, %v743_v47  ;;  %v621_v53 = vpop.f32.mrb[3].mxu1 }
 0x3ba   :  { %v1065_v54 = vadd.f32 %v1018_v41, %v745_v49 }
 0x3bb   :  { %v1090_v6 = vadd.f32 %v1073_v23, %v1064_v52 }
 0x3bc   :  { %v1091_v5 = vadd.f32 %v1077_v22, %v1065_v54 }
 0x3bd   :  { %v1206_v8 = vmul.f32 -1.442695, %v1090_v6 }
 0x3be   :  { %v1207_v7 = vmul.f32 -1.442695, %v1091_v5 }
 0x3c0   :  { %1383 = vpow2.f32 %v1207_v7 }
 0x3c1   :  { %1385 = vpow2.f32 %v1206_v8 }
 0x3c6   :  { %v657_v57 = vpop.f32.mrb[4].mxu1 }
 0x3c7   :  { %v659_v58 = vpop.f32.mrb[5].mxu1 }
 0x3c8   :  { %v661_v59 = vpop.f32.mrb[6].mxu1 }
 0x3c9   :  { %v662_v60 = vpop.f32.mrb[7].mxu1 }
 0x3ca   :  { %v1384_v9 = vpop.eup %1383 }
 0x3cb   :  { %v1386_v11 = vpop.eup %1385  ;;  %v1103_v12 = vadd.f32 1.0, %v1384_v9 }
 0x3cc   :  { %v1097_v14 = vadd.f32 1.0, %v1386_v11 }
 0x3cd   :  { %1387 = vrcp.f32 %v1103_v12 }
 0x3ce   :  { %v783_v62 = vpop.f32.mrb[8].mxu1  ;;  %1389 = vrcp.f32 %v1097_v14 }
 0x3cf   :  { %v784_v10 = vadd.f32 %v783_v62, %v657_v57  ;;  %v785_v0 = vpop.f32.mrb[9].mxu1 }
 0x3d0   :  { %v786_v1 = vadd.f32 %v785_v0, %v659_v58  ;;  %v787_v2 = vpop.f32.mrb[10].mxu1 }
 0x3d1   :  { %v788_v4 = vpop.f32.mrb[11].mxu1 }
 0x3d7   :  { %v1388_v25 = vpop.eup %1387 }
 0x3d8   :  { %v1390_v26 = vpop.eup %1389  ;;  %v1113_v63 = vmul.f32 %v1388_v25, %v136_v56 }
 0x3ee   :  { %v1057_v15 = vpop.f32.mrb[12].mxu1 }
 0x3ef   :  { %v1066_v16 = vadd.f32 %v1057_v15, %v784_v10  ;;  %v1059_v17 = vpop.f32.mrb[13].mxu1 }
 0x3f0   :  { %v1067_v45 = vadd.f32 %v1059_v17, %v786_v1  ;;  %v1061_v18 = vpop.f32.mrb[14].mxu1 }
 0x3f1   :  { %v1092_v19 = vadd.f32 %v1081_v13, %v1066_v16  ;;  %v1062_v20 = vpop.f32.mrb[15].mxu1 }
 0x3f2   :  { %v1093_v21 = vadd.f32 %v1085_v44, %v1067_v45 }
 0x3f3   :  { %1391 = vtanh.f32 %v1092_v19 }
 0x3f4   :  { %v1208_v24 = vmul.f32 -1.442695, %v1093_v21 }
 0x3f6   :  { %1393 = vpow2.f32 %v1208_v24 }
 0x3fd   :  { %v1392_v61 = vpop.eup %1391 }
 0x3fe   :  { %v1114_v27 = vmul.f32 %v1392_v61, %v1390_v26 }
 0x400   :  { %v1394_v28 = vpop.eup %1393  ;;  %v1115_v29 = vadd.f32 %v1114_v27, %v1113_v63 }
 0x401   :  { %v1110_v30 = vadd.f32 1.0, %v1394_v28 }
 0x402   :  { %1395 = vtanh.f32 %v1115_v29  ;;  %1119 = vst [vmem:[%s1918_s13] sm:$0xff] %v1115_v29 }
 0x403   :  { %1397 = vrcp.f32 %v1110_v30 }
 0x40c   :  { %v1396_v31 = vpop.eup %1395 }
 0x40d   :  { %v1398_v32 = vpop.eup %1397 }
 0x40e   :  { %v1117_v33 = vmul.f32 %v1398_v32, %v1396_v31 }
 0x410   :  { %1118 = vst [vmem:[%s1917_s12] sm:$0xff] %v1117_v33 }
 0x411   :  { %1133 = vsyncpa [#allocation3], 1 }
 0x412   :  { %1134 = vsyncpa [#allocation5], 1 }
 0x413   :  { %1135 = vsyncpa [#allocation8], 1 }
 0x414   :  { %1136 = vsyncpa [#allocation11], 1 }

</bundles_post_ra>
